<compile_context>
chip_gen: v5e
topology: v5e:2x2
jax: 0.10.0
libtpu: 0.0.40
codegen_flags: <defaults>
</compile_context>

<pallas_src>
import functools

import numpy as np
import jax
import jax.numpy as jnp
from jax.experimental import pallas as pl
from jax.experimental.pallas import tpu as pltpu


def _haar_filter_matrix():
    """db1 analysis filters as (4, 4) filt[k, p], p = 2*dy + dx (used by the reference).

    Mirrors create_wavelet_filter(): filters built from the *reversed* pywt dec_lo /
    dec_hi taps, identical for every channel (depthwise), k in the module's order.
    """
    s = 1.0 / np.sqrt(2.0)
    dec_lo = np.array([s, s], np.float32)     # pywt db1 dec_lo
    dec_hi = np.array([-s, s], np.float32)    # pywt db1 dec_hi
    lo = dec_lo[::-1]
    hi = dec_hi[::-1]
    taps = []
    for row, col in ((lo, lo), (hi, lo), (lo, hi), (hi, hi)):
        taps.append(np.outer(row, col))       # f_k[dy, dx] = row[dy] * col[dx]
    return jnp.asarray(np.stack(taps, 0).reshape(4, 4))


# --------------------------------------------------------------------------------------
# Pass 1: Haar DWT (add-only butterfly) + both 1x1 convs (+bias) + partial BN statistics
# --------------------------------------------------------------------------------------
def _wt_pass1_kernel(C, W, W2, wlo_ref, blo_ref, whi_ref, bhi_ref, s_ref, x_ref,
                     lowpre_ref, highpre_ref, stats_ref):
    # x_ref       : (1, C, TH, 2W) VMEM; lane u<W -> pixel (2y, u), u>=W -> (2y+1, u-W)
    # s_ref       : (W, 2*W2)      VMEM; horizontal pair-sum | pair-diff matrix (has 0.5)
    # wlo/blo     : (C, C) / (C,)  SMEM  align_low  1x1 conv weight / bias
    # whi/bhi     : (C, 3C)/ (C,)  SMEM  align_high 1x1 conv weight / bias
    # lowpre/highpre : (1, C, TH, W2)   pre-BN activations (bf16 by default)
    # stats_ref   : (1, 1, 4, C)   f32  [sum_lo, sumsq_lo, sum_hi, sumsq_hi]
    s_mat = s_ref[...]
    low_acc = [None] * C
    high_acc = [None] * C

    for ci in range(C):
        row_pair = x_ref[0, ci]                    # (TH, 2W) f32
        vs = row_pair[:, :W] + row_pair[:, W:]     # vertical sum  (even + odd row)
        vd = row_pair[:, :W] - row_pair[:, W:]     # vertical diff (even - odd row)
        # Horizontal pair sum/diff on the lane axis via one MXU matmul per channel
        # (avoids lane-stride-2 gathers; the Haar 0.5 gain is folded into s_mat).
        ys = jnp.dot(vs, s_mat, precision=jax.lax.Precision.HIGHEST,
                     preferred_element_type=jnp.float32)   # (TH, 2*W2)
        yd = jnp.dot(vd, s_mat, precision=jax.lax.Precision.HIGHEST,
                     preferred_element_type=jnp.float32)
        ll, k2 = ys[:, :W2], ys[:, W2:]            # LL and the module's subband k=2
        k1, k3 = yd[:, :W2], yd[:, W2:]            # subbands k=1 and k=3
        # 1x1 convs as unrolled scalar-broadcast VPU MACs (C is tiny -> skip the MXU);
        # subbands are consumed immediately per ci to bound the live set.
        for co in range(C):
            dl = ll * wlo_ref[co, ci]
            dh = (k1 * whi_ref[co, 3 * ci]
                  + k2 * whi_ref[co, 3 * ci + 1]
                  + k3 * whi_ref[co, 3 * ci + 2])
            low_acc[co] = dl if low_acc[co] is None else low_acc[co] + dl
            high_acc[co] = dh if high_acc[co] is None else high_acc[co] + dh

    low_f32 = jnp.stack([low_acc[co] + blo_ref[co] for co in range(C)], axis=0)
    high_f32 = jnp.stack([high_acc[co] + bhi_ref[co] for co in range(C)], axis=0)

    lowpre_ref[0] = low_f32.astype(lowpre_ref.dtype)
    highpre_ref[0] = high_f32.astype(highpre_ref.dtype)

    def _sums(v):                                  # (C, TH, W2) -> (C,)
        return jnp.sum(jnp.sum(v, axis=2), axis=1)

    # Partial BN statistics from the in-register f32 values (no re-read of the outputs).
    stats_ref[0, 0] = jnp.stack(
        [_sums(low_f32), _sums(low_f32 * low_f32),
         _sums(high_f32), _sums(high_f32 * high_f32)], axis=0)


# --------------------------------------------------------------------------------------
# Pass 2: apply BatchNorm affine (precomputed scale/shift) + ReLU6
# --------------------------------------------------------------------------------------
def _wt_pass2_kernel(C, sclo_ref, shlo_ref, schi_ref, shhi_ref,
                     lowpre_ref, highpre_ref, low_ref, high_ref):
    for co in range(C):
        low_ref[0, co] = jnp.clip(
            lowpre_ref[0, co].astype(jnp.float32) * sclo_ref[co] + shlo_ref[co],
            0.0, 6.0)
        high_ref[0, co] = jnp.clip(
            highpre_ref[0, co].astype(jnp.float32) * schi_ref[co] + shhi_ref[co],
            0.0, 6.0)


# --------------------------------------------------------------------------------------
# Wrapper
# --------------------------------------------------------------------------------------
def _vmem_limit_bytes():
    """~75% of physical VMEM (headroom for compiler scratch / double buffering).
    Fallback 48 MiB is safe on v7x (64 MiB) as well as v5e/v6e (128 MiB)."""
    try:
        info = pltpu.get_tpu_info()
        cap = getattr(info, "vmem_capacity_bytes", None)
        if cap:
            return int(cap) * 3 // 4
    except Exception:
        pass
    return 48 * 2**20


def _pick_tile_rows(h2, row_bytes, budget_bytes, override=None, align=16):
    """Largest multiple-of-`align` divisor of h2 whose input tile stays under budget.
    Falls back to the full dim when h2 isn't align-divisible (always a legal block),
    or to the smallest legal tile when even that exceeds the budget."""
    if override is not None:
        assert h2 % override == 0 and (override % align == 0 or override == h2)
        return override
    if h2 % align != 0 or h2 * row_bytes <= budget_bytes:
        return h2
    best = align
    for th in range(align, h2 + 1, align):
        if h2 % th == 0 and th * row_bytes <= budget_bytes:
            best = th
    return best


def wt_forward(x, params, *, eps=1e-5, tile_rows=None,
               intermediate_dtype=jnp.bfloat16):
    """Forward pass of WT (wt_levels=1, db1).

    x: (N, C, H, W) float32 -> (low, high), each (N, C, ceil(H/2), ceil(W/2)) float32.
    """
    x = x.astype(jnp.float32)
    N, C, H, W = x.shape

    # Pad bottom/right to even spatial dims (mirrors F.pad in WT.forward).
    ph, pw = H % 2, W % 2
    if ph or pw:
        # TODO(synk): the torch reshape-based DWT assumes even H/W; we pad like the
        # module does and return ceil(H/2) x ceil(W/2) maps (pad pixels enter BN stats).
        x = jnp.pad(x, ((0, 0), (0, 0), (0, ph), (0, pw)))
    Hp, Wp = H + ph, W + pw
    H2, W2 = Hp // 2, Wp // 2

    # Free (metadata-only) reshape: each row *pair* lands on the lane axis so pass 1
    # can split even/odd rows with contiguous lane slices -- no wrapper polyphase
    # materialization, no strided loads.
    x2 = x.reshape(N, C, H2, 2 * Wp)

    # Horizontal butterfly matrix: (v @ S)[:, j] = 0.5*(v[2j]+v[2j+1]) for j < W2 and
    # 0.5*(v[2j']-v[2j'+1]) for j = W2+j'.  Carries the Haar 0.5 so the DWT is add-only.
    s_np = np.zeros((Wp, 2 * W2), np.float32)
    for j in range(W2):
        s_np[2 * j, j] = 0.5
        s_np[2 * j + 1, j] = 0.5
        s_np[2 * j, W2 + j] = 0.5
        s_np[2 * j + 1, W2 + j] = -0.5
    s_mat = jnp.asarray(s_np)

    w_lo = params["low_w"].reshape(C, C).astype(jnp.float32)
    b_lo = params["low_b"].astype(jnp.float32)
    w_hi = params["high_w"].reshape(C, 3 * C).astype(jnp.float32)
    b_hi = params["high_b"].astype(jnp.float32)

    # Generation-aware budgets: several-MiB input tiles to amortize per-step overhead.
    vmem_limit = _vmem_limit_bytes()
    in_row_bytes = 4 * C * 2 * Wp                       # f32 bytes of one row-pair row
    TH = _pick_tile_rows(H2, in_row_bytes, budget_bytes=vmem_limit // 8,
                         override=tile_rows)
    n_h = H2 // TH
    grid = (N, n_h)

    cparams = pltpu.CompilerParams(
        dimension_semantics=("parallel", "parallel"),
        vmem_limit_bytes=vmem_limit)
    smem = pl.BlockSpec(memory_space=pltpu.MemorySpace.SMEM)

    # ---- pass 1: DWT + 1x1 convs (+bias) + per-block partial BN statistics ----
    low_pre, high_pre, stats = pl.pallas_call(
        functools.partial(_wt_pass1_kernel, C, Wp, W2),
        out_shape=(
            jax.ShapeDtypeStruct((N, C, H2, W2), intermediate_dtype),
            jax.ShapeDtypeStruct((N, C, H2, W2), intermediate_dtype),
            jax.ShapeDtypeStruct((N, n_h, 4, C), jnp.float32),
        ),
        grid=grid,
        in_specs=[
            smem, smem, smem, smem,
            pl.BlockSpec((Wp, 2 * W2), lambda n, h: (0, 0)),
            pl.BlockSpec((1, C, TH, 2 * Wp), lambda n, h: (n, 0, h, 0)),
        ],
        out_specs=(
            pl.BlockSpec((1, C, TH, W2), lambda n, h: (n, 0, h, 0)),
            pl.BlockSpec((1, C, TH, W2), lambda n, h: (n, 0, h, 0)),
            pl.BlockSpec((1, 1, 4, C), lambda n, h: (n, h, 0, 0)),
        ),
        compiler_params=cparams,
    )(w_lo, b_lo, w_hi, b_hi, s_mat, x2)

    # ---- tiny XLA glue: combine per-block stats -> per-channel BN scale/shift ----
    tot = jnp.sum(stats, axis=(0, 1))                   # (4, C)
    cnt = float(N * H2 * W2)
    mean_lo, mean_hi = tot[0] / cnt, tot[2] / cnt
    var_lo = jnp.maximum(tot[1] / cnt - mean_lo * mean_lo, 0.0)
    var_hi = jnp.maximum(tot[3] / cnt - mean_hi * mean_hi, 0.0)
    scale_lo = params["low_gamma"].astype(jnp.float32) * jax.lax.rsqrt(var_lo + eps)
    shift_lo = params["low_beta"].astype(jnp.float32) - mean_lo * scale_lo
    scale_hi = params["high_gamma"].astype(jnp.float32) * jax.lax.rsqrt(var_hi + eps)
    shift_hi = params["high_beta"].astype(jnp.float32) - mean_hi * scale_hi

    # ---- pass 2: apply BN affine + ReLU6 ----
    low, high = pl.pallas_call(
        functools.partial(_wt_pass2_kernel, C),
        out_shape=(
            jax.ShapeDtypeStruct((N, C, H2, W2), jnp.float32),
            jax.ShapeDtypeStruct((N, C, H2, W2), jnp.float32),
        ),
        grid=grid,
        in_specs=[
            smem, smem, smem, smem,
            pl.BlockSpec((1, C, TH, W2), lambda n, h: (n, 0, h, 0)),
            pl.BlockSpec((1, C, TH, W2), lambda n, h: (n, 0, h, 0)),
        ],
        out_specs=(
            pl.BlockSpec((1, C, TH, W2), lambda n, h: (n, 0, h, 0)),
            pl.BlockSpec((1, C, TH, W2), lambda n, h: (n, 0, h, 0)),
        ),
        compiler_params=cparams,
    )(scale_lo, shift_lo, scale_hi, shift_hi, low_pre, high_pre)

    return low, high


# --------------------------------------------------------------------------------------
# Pure-JAX reference (mirrors WT.forward) used only for the correctness sanity check.
# --------------------------------------------------------------------------------------
def _reference(x, params, eps=1e-5):
    x = x.astype(jnp.float32)
    N, C, H, W = x.shape
    filt = _haar_filter_matrix()
    polys = [x[:, :, 0::2, 0::2], x[:, :, 0::2, 1::2],
             x[:, :, 1::2, 0::2], x[:, :, 1::2, 1::2]]
    subs = [sum(filt[k, p] * polys[p] for p in range(4)) for k in range(4)]
    low_in = subs[0]
    high_in = jnp.stack(subs[1:], axis=2).reshape(N, 3 * C, H // 2, W // 2)

    def conv_bn_relu6(z, w, b, gamma, beta):
        y = jnp.einsum("oc,nchw->nohw", w.reshape(w.shape[0], -1), z,
                       precision=jax.lax.Precision.HIGHEST)
        y = y + b[None, :, None, None]
        mean = jnp.mean(y, axis=(0, 2, 3), keepdims=True)
        var = jnp.mean((y - mean) ** 2, axis=(0, 2, 3), keepdims=True)
        y = (y - mean) * (gamma[None, :, None, None] * jax.lax.rsqrt(var + eps))
        y = y + beta[None, :, None, None]
        return jnp.clip(y, 0.0, 6.0)

    low = conv_bn_relu6(low_in, params["low_w"], params["low_b"],
                        params["low_gamma"], params["low_beta"])
    high = conv_bn_relu6(high_in, params["high_w"], params["high_b"],
                         params["high_gamma"], params["high_beta"])
    return low, high


if __name__ == "__main__":
    key = jax.random.PRNGKey(0)
    ks = jax.random.split(key, 9)
    N, C, H, W = 2, 4, 16, 16

    x = jax.random.normal(ks[0], (N, C, H, W), jnp.float32)
    params = dict(
        low_w=0.3 * jax.random.normal(ks[1], (C, C, 1, 1), jnp.float32),
        low_b=0.1 * jax.random.normal(ks[2], (C,), jnp.float32),
        low_gamma=1.0 + 0.1 * jax.random.normal(ks[3], (C,), jnp.float32),
        low_beta=0.1 * jax.random.normal(ks[4], (C,), jnp.float32),
        high_w=0.3 * jax.random.normal(ks[5], (C, 3 * C, 1, 1), jnp.float32),
        high_b=0.1 * jax.random.normal(ks[6], (C,), jnp.float32),
        high_gamma=1.0 + 0.1 * jax.random.normal(ks[7], (C,), jnp.float32),
        high_beta=0.1 * jax.random.normal(ks[8], (C,), jnp.float32),
    )

    # Default (production) path: bf16 pre-BN intermediates.
    fwd = jax.jit(wt_forward)
    low, high = fwd(x, params)
    jax.block_until_ready((low, high))

    assert low.shape == (N, C, H // 2, W // 2), low.shape
    assert high.shape == (N, C, H // 2, W // 2), high.shape
    assert low.dtype == jnp.float32 and high.dtype == jnp.float32

    low_ref, high_ref = _reference(x, params)

    # Exact-math path (f32 intermediates): tight tolerance proves the kernel math.
    fwd32 = jax.jit(functools.partial(wt_forward, intermediate_dtype=jnp.float32))
    low32, high32 = fwd32(x, params)
    jax.block_until_ready((low32, high32))
    np.testing.assert_allclose(np.asarray(low32), np.asarray(low_ref),
                               rtol=1e-3, atol=1e-3)
    np.testing.assert_allclose(np.asarray(high32), np.asarray(high_ref),
                               rtol=1e-3, atol=1e-3)

    # Default bf16 path: error bounded by the 2^-9 rounding of the pre-BN activations.
    np.testing.assert_allclose(np.asarray(low), np.asarray(low_ref),
                               rtol=1e-2, atol=2e-2)
    np.testing.assert_allclose(np.asarray(high), np.asarray(high_ref),
                               rtol=1e-2, atol=2e-2)
    print("KERNEL_OK")
</pallas_src>

<mosaic_0001>
module attributes {stable_mosaic.version = 11 : i64} {
  func.func @_wt_pass1_kernel(%arg0: i32, %arg1: i32, %arg2: memref<4x4xf32, #tpu.memory_space<smem>>, %arg3: memref<4xf32, #tpu.memory_space<smem>>, %arg4: memref<4x12xf32, #tpu.memory_space<smem>>, %arg5: memref<4xf32, #tpu.memory_space<smem>>, %arg6: memref<16x16xf32, #tpu.memory_space<vmem>>, %arg7: memref<1x4x8x32xf32, #tpu.memory_space<vmem>>, %arg8: memref<1x4x8x8xbf16, #tpu.memory_space<vmem>>, %arg9: memref<1x4x8x8xbf16, #tpu.memory_space<vmem>>, %arg10: memref<1x1x4x4xf32, #tpu.memory_space<vmem>>) attributes {dimension_semantics = [#tpu.dimension_semantics<parallel>, #tpu.dimension_semantics<parallel>], iteration_bounds = array<i64: 2, 1>, scalar_prefetch = 0 : i64, scratch_operands = 0 : i64, tpu.core_type = #tpu.core_type<tc>, window_params = [{transform_indices = @transform_0, window_bounds = array<i64: 4, 4>}, {transform_indices = @transform_1, window_bounds = array<i64: 4>}, {transform_indices = @transform_2, window_bounds = array<i64: 4, 12>}, {transform_indices = @transform_3, window_bounds = array<i64: 4>}, {pipeline_mode = #tpu.pipeline_mode<synchronous>, transform_indices = @transform_4, window_bounds = array<i64: 16, 16>}, {transform_indices = @transform_5, window_bounds = array<i64: 1, 4, 8, 32>}, {transform_indices = @transform_6, window_bounds = array<i64: 1, 4, 8, 8>}, {transform_indices = @transform_7, window_bounds = array<i64: 1, 4, 8, 8>}, {transform_indices = @transform_8, window_bounds = array<i64: 1, 1, 4, 4>}]} {
    %c0 = arith.constant 0 : index
    %c0_0 = arith.constant 0 : index
    %0 = vector.load %arg6[%c0, %c0_0] : memref<16x16xf32, #tpu.memory_space<vmem>>, vector<16x16xf32>
    %c0_1 = arith.constant 0 : index
    %c0_2 = arith.constant 0 : index
    %c0_3 = arith.constant 0 : index
    %c0_4 = arith.constant 0 : index
    %1 = vector.load %arg7[%c0_1, %c0_2, %c0_3, %c0_4] : memref<1x4x8x32xf32, #tpu.memory_space<vmem>>, vector<1x1x8x32xf32>
    %2 = vector.shape_cast %1 : vector<1x1x8x32xf32> to vector<8x32xf32>
    %3 = vector.extract_strided_slice %2 {offsets = [0, 0], sizes = [8, 16], strides = [1, 1]} : vector<8x32xf32> to vector<8x16xf32>
    %4 = vector.extract_strided_slice %2 {offsets = [0, 16], sizes = [8, 16], strides = [1, 1]} : vector<8x32xf32> to vector<8x16xf32>
    %5 = arith.addf %3, %4 : vector<8x16xf32>
    %6 = vector.extract_strided_slice %2 {offsets = [0, 0], sizes = [8, 16], strides = [1, 1]} : vector<8x32xf32> to vector<8x16xf32>
    %7 = vector.extract_strided_slice %2 {offsets = [0, 16], sizes = [8, 16], strides = [1, 1]} : vector<8x32xf32> to vector<8x16xf32>
    %8 = arith.subf %6, %7 : vector<8x16xf32>
    %cst = arith.constant dense<0.000000e+00> : vector<8x16xf32>
    %9 = tpu.matmul %5, %0, %cst {dimension_numbers = #tpu.dot_dimension_numbers<[1], [0], [0], [1], [0, 0, 1, 1], [], []>, precision = #tpu.contract_precision<fp32>} : vector<8x16xf32>, vector<16x16xf32>, vector<8x16xf32> -> vector<8x16xf32>
    %cst_5 = arith.constant dense<0.000000e+00> : vector<8x16xf32>
    %10 = tpu.matmul %8, %0, %cst_5 {dimension_numbers = #tpu.dot_dimension_numbers<[1], [0], [0], [1], [0, 0, 1, 1], [], []>, precision = #tpu.contract_precision<fp32>} : vector<8x16xf32>, vector<16x16xf32>, vector<8x16xf32> -> vector<8x16xf32>
    %11 = vector.extract_strided_slice %9 {offsets = [0, 0], sizes = [8, 8], strides = [1, 1]} : vector<8x16xf32> to vector<8x8xf32>
    %12 = vector.extract_strided_slice %9 {offsets = [0, 8], sizes = [8, 8], strides = [1, 1]} : vector<8x16xf32> to vector<8x8xf32>
    %13 = vector.extract_strided_slice %10 {offsets = [0, 0], sizes = [8, 8], strides = [1, 1]} : vector<8x16xf32> to vector<8x8xf32>
    %14 = vector.extract_strided_slice %10 {offsets = [0, 8], sizes = [8, 8], strides = [1, 1]} : vector<8x16xf32> to vector<8x8xf32>
    %c0_6 = arith.constant 0 : index
    %c0_7 = arith.constant 0 : index
    %15 = memref.load %arg2[%c0_6, %c0_7] : memref<4x4xf32, #tpu.memory_space<smem>>
    %16 = vector.broadcast %15 : f32 to vector<8x8xf32>
    %17 = arith.mulf %11, %16 : vector<8x8xf32>
    %c0_8 = arith.constant 0 : index
    %c0_9 = arith.constant 0 : index
    %18 = memref.load %arg4[%c0_8, %c0_9] : memref<4x12xf32, #tpu.memory_space<smem>>
    %19 = vector.broadcast %18 : f32 to vector<8x8xf32>
    %20 = arith.mulf %13, %19 : vector<8x8xf32>
    %c0_10 = arith.constant 0 : index
    %c1 = arith.constant 1 : index
    %21 = memref.load %arg4[%c0_10, %c1] : memref<4x12xf32, #tpu.memory_space<smem>>
    %22 = vector.broadcast %21 : f32 to vector<8x8xf32>
    %23 = arith.mulf %12, %22 : vector<8x8xf32>
    %24 = arith.addf %20, %23 : vector<8x8xf32>
    %c0_11 = arith.constant 0 : index
    %c2 = arith.constant 2 : index
    %25 = memref.load %arg4[%c0_11, %c2] : memref<4x12xf32, #tpu.memory_space<smem>>
    %26 = vector.broadcast %25 : f32 to vector<8x8xf32>
    %27 = arith.mulf %14, %26 : vector<8x8xf32>
    %28 = arith.addf %24, %27 : vector<8x8xf32>
    %c1_12 = arith.constant 1 : index
    %c0_13 = arith.constant 0 : index
    %29 = memref.load %arg2[%c1_12, %c0_13] : memref<4x4xf32, #tpu.memory_space<smem>>
    %30 = vector.broadcast %29 : f32 to vector<8x8xf32>
    %31 = arith.mulf %11, %30 : vector<8x8xf32>
    %c1_14 = arith.constant 1 : index
    %c0_15 = arith.constant 0 : index
    %32 = memref.load %arg4[%c1_14, %c0_15] : memref<4x12xf32, #tpu.memory_space<smem>>
    %33 = vector.broadcast %32 : f32 to vector<8x8xf32>
    %34 = arith.mulf %13, %33 : vector<8x8xf32>
    %c1_16 = arith.constant 1 : index
    %c1_17 = arith.constant 1 : index
    %35 = memref.load %arg4[%c1_16, %c1_17] : memref<4x12xf32, #tpu.memory_space<smem>>
    %36 = vector.broadcast %35 : f32 to vector<8x8xf32>
    %37 = arith.mulf %12, %36 : vector<8x8xf32>
    %38 = arith.addf %34, %37 : vector<8x8xf32>
    %c1_18 = arith.constant 1 : index
    %c2_19 = arith.constant 2 : index
    %39 = memref.load %arg4[%c1_18, %c2_19] : memref<4x12xf32, #tpu.memory_space<smem>>
    %40 = vector.broadcast %39 : f32 to vector<8x8xf32>
    %41 = arith.mulf %14, %40 : vector<8x8xf32>
    %42 = arith.addf %38, %41 : vector<8x8xf32>
    %c2_20 = arith.constant 2 : index
    %c0_21 = arith.constant 0 : index
    %43 = memref.load %arg2[%c2_20, %c0_21] : memref<4x4xf32, #tpu.memory_space<smem>>
    %44 = vector.broadcast %43 : f32 to vector<8x8xf32>
    %45 = arith.mulf %11, %44 : vector<8x8xf32>
    %c2_22 = arith.constant 2 : index
    %c0_23 = arith.constant 0 : index
    %46 = memref.load %arg4[%c2_22, %c0_23] : memref<4x12xf32, #tpu.memory_space<smem>>
    %47 = vector.broadcast %46 : f32 to vector<8x8xf32>
    %48 = arith.mulf %13, %47 : vector<8x8xf32>
    %c2_24 = arith.constant 2 : index
    %c1_25 = arith.constant 1 : index
    %49 = memref.load %arg4[%c2_24, %c1_25] : memref<4x12xf32, #tpu.memory_space<smem>>
    %50 = vector.broadcast %49 : f32 to vector<8x8xf32>
    %51 = arith.mulf %12, %50 : vector<8x8xf32>
    %52 = arith.addf %48, %51 : vector<8x8xf32>
    %c2_26 = arith.constant 2 : index
    %c2_27 = arith.constant 2 : index
    %53 = memref.load %arg4[%c2_26, %c2_27] : memref<4x12xf32, #tpu.memory_space<smem>>
    %54 = vector.broadcast %53 : f32 to vector<8x8xf32>
    %55 = arith.mulf %14, %54 : vector<8x8xf32>
    %56 = arith.addf %52, %55 : vector<8x8xf32>
    %c3 = arith.constant 3 : index
    %c0_28 = arith.constant 0 : index
    %57 = memref.load %arg2[%c3, %c0_28] : memref<4x4xf32, #tpu.memory_space<smem>>
    %58 = vector.broadcast %57 : f32 to vector<8x8xf32>
    %59 = arith.mulf %11, %58 : vector<8x8xf32>
    %c3_29 = arith.constant 3 : index
    %c0_30 = arith.constant 0 : index
    %60 = memref.load %arg4[%c3_29, %c0_30] : memref<4x12xf32, #tpu.memory_space<smem>>
    %61 = vector.broadcast %60 : f32 to vector<8x8xf32>
    %62 = arith.mulf %13, %61 : vector<8x8xf32>
    %c3_31 = arith.constant 3 : index
    %c1_32 = arith.constant 1 : index
    %63 = memref.load %arg4[%c3_31, %c1_32] : memref<4x12xf32, #tpu.memory_space<smem>>
    %64 = vector.broadcast %63 : f32 to vector<8x8xf32>
    %65 = arith.mulf %12, %64 : vector<8x8xf32>
    %66 = arith.addf %62, %65 : vector<8x8xf32>
    %c3_33 = arith.constant 3 : index
    %c2_34 = arith.constant 2 : index
    %67 = memref.load %arg4[%c3_33, %c2_34] : memref<4x12xf32, #tpu.memory_space<smem>>
    %68 = vector.broadcast %67 : f32 to vector<8x8xf32>
    %69 = arith.mulf %14, %68 : vector<8x8xf32>
    %70 = arith.addf %66, %69 : vector<8x8xf32>
    %c0_35 = arith.constant 0 : index
    %c1_36 = arith.constant 1 : index
    %c0_37 = arith.constant 0 : index
    %c0_38 = arith.constant 0 : index
    %71 = vector.load %arg7[%c0_35, %c1_36, %c0_37, %c0_38] : memref<1x4x8x32xf32, #tpu.memory_space<vmem>>, vector<1x1x8x32xf32>
    %72 = vector.shape_cast %71 : vector<1x1x8x32xf32> to vector<8x32xf32>
    %73 = vector.extract_strided_slice %72 {offsets = [0, 0], sizes = [8, 16], strides = [1, 1]} : vector<8x32xf32> to vector<8x16xf32>
    %74 = vector.extract_strided_slice %72 {offsets = [0, 16], sizes = [8, 16], strides = [1, 1]} : vector<8x32xf32> to vector<8x16xf32>
    %75 = arith.addf %73, %74 : vector<8x16xf32>
    %76 = vector.extract_strided_slice %72 {offsets = [0, 0], sizes = [8, 16], strides = [1, 1]} : vector<8x32xf32> to vector<8x16xf32>
    %77 = vector.extract_strided_slice %72 {offsets = [0, 16], sizes = [8, 16], strides = [1, 1]} : vector<8x32xf32> to vector<8x16xf32>
    %78 = arith.subf %76, %77 : vector<8x16xf32>
    %cst_39 = arith.constant dense<0.000000e+00> : vector<8x16xf32>
    %79 = tpu.matmul %75, %0, %cst_39 {dimension_numbers = #tpu.dot_dimension_numbers<[1], [0], [0], [1], [0, 0, 1, 1], [], []>, precision = #tpu.contract_precision<fp32>} : vector<8x16xf32>, vector<16x16xf32>, vector<8x16xf32> -> vector<8x16xf32>
    %cst_40 = arith.constant dense<0.000000e+00> : vector<8x16xf32>
    %80 = tpu.matmul %78, %0, %cst_40 {dimension_numbers = #tpu.dot_dimension_numbers<[1], [0], [0], [1], [0, 0, 1, 1], [], []>, precision = #tpu.contract_precision<fp32>} : vector<8x16xf32>, vector<16x16xf32>, vector<8x16xf32> -> vector<8x16xf32>
    %81 = vector.extract_strided_slice %79 {offsets = [0, 0], sizes = [8, 8], strides = [1, 1]} : vector<8x16xf32> to vector<8x8xf32>
    %82 = vector.extract_strided_slice %79 {offsets = [0, 8], sizes = [8, 8], strides = [1, 1]} : vector<8x16xf32> to vector<8x8xf32>
    %83 = vector.extract_strided_slice %80 {offsets = [0, 0], sizes = [8, 8], strides = [1, 1]} : vector<8x16xf32> to vector<8x8xf32>
    %84 = vector.extract_strided_slice %80 {offsets = [0, 8], sizes = [8, 8], strides = [1, 1]} : vector<8x16xf32> to vector<8x8xf32>
    %c0_41 = arith.constant 0 : index
    %c1_42 = arith.constant 1 : index
    %85 = memref.load %arg2[%c0_41, %c1_42] : memref<4x4xf32, #tpu.memory_space<smem>>
    %86 = vector.broadcast %85 : f32 to vector<8x8xf32>
    %87 = arith.mulf %81, %86 : vector<8x8xf32>
    %c0_43 = arith.constant 0 : index
    %c3_44 = arith.constant 3 : index
    %88 = memref.load %arg4[%c0_43, %c3_44] : memref<4x12xf32, #tpu.memory_space<smem>>
    %89 = vector.broadcast %88 : f32 to vector<8x8xf32>
    %90 = arith.mulf %83, %89 : vector<8x8xf32>
    %c0_45 = arith.constant 0 : index
    %c4 = arith.constant 4 : index
    %91 = memref.load %arg4[%c0_45, %c4] : memref<4x12xf32, #tpu.memory_space<smem>>
    %92 = vector.broadcast %91 : f32 to vector<8x8xf32>
    %93 = arith.mulf %82, %92 : vector<8x8xf32>
    %94 = arith.addf %90, %93 : vector<8x8xf32>
    %c0_46 = arith.constant 0 : index
    %c5 = arith.constant 5 : index
    %95 = memref.load %arg4[%c0_46, %c5] : memref<4x12xf32, #tpu.memory_space<smem>>
    %96 = vector.broadcast %95 : f32 to vector<8x8xf32>
    %97 = arith.mulf %84, %96 : vector<8x8xf32>
    %98 = arith.addf %94, %97 : vector<8x8xf32>
    %99 = arith.addf %17, %87 : vector<8x8xf32>
    %100 = arith.addf %28, %98 : vector<8x8xf32>
    %c1_47 = arith.constant 1 : index
    %c1_48 = arith.constant 1 : index
    %101 = memref.load %arg2[%c1_47, %c1_48] : memref<4x4xf32, #tpu.memory_space<smem>>
    %102 = vector.broadcast %101 : f32 to vector<8x8xf32>
    %103 = arith.mulf %81, %102 : vector<8x8xf32>
    %c1_49 = arith.constant 1 : index
    %c3_50 = arith.constant 3 : index
    %104 = memref.load %arg4[%c1_49, %c3_50] : memref<4x12xf32, #tpu.memory_space<smem>>
    %105 = vector.broadcast %104 : f32 to vector<8x8xf32>
    %106 = arith.mulf %83, %105 : vector<8x8xf32>
    %c1_51 = arith.constant 1 : index
    %c4_52 = arith.constant 4 : index
    %107 = memref.load %arg4[%c1_51, %c4_52] : memref<4x12xf32, #tpu.memory_space<smem>>
    %108 = vector.broadcast %107 : f32 to vector<8x8xf32>
    %109 = arith.mulf %82, %108 : vector<8x8xf32>
    %110 = arith.addf %106, %109 : vector<8x8xf32>
    %c1_53 = arith.constant 1 : index
    %c5_54 = arith.constant 5 : index
    %111 = memref.load %arg4[%c1_53, %c5_54] : memref<4x12xf32, #tpu.memory_space<smem>>
    %112 = vector.broadcast %111 : f32 to vector<8x8xf32>
    %113 = arith.mulf %84, %112 : vector<8x8xf32>
    %114 = arith.addf %110, %113 : vector<8x8xf32>
    %115 = arith.addf %31, %103 : vector<8x8xf32>
    %116 = arith.addf %42, %114 : vector<8x8xf32>
    %c2_55 = arith.constant 2 : index
    %c1_56 = arith.constant 1 : index
    %117 = memref.load %arg2[%c2_55, %c1_56] : memref<4x4xf32, #tpu.memory_space<smem>>
    %118 = vector.broadcast %117 : f32 to vector<8x8xf32>
    %119 = arith.mulf %81, %118 : vector<8x8xf32>
    %c2_57 = arith.constant 2 : index
    %c3_58 = arith.constant 3 : index
    %120 = memref.load %arg4[%c2_57, %c3_58] : memref<4x12xf32, #tpu.memory_space<smem>>
    %121 = vector.broadcast %120 : f32 to vector<8x8xf32>
    %122 = arith.mulf %83, %121 : vector<8x8xf32>
    %c2_59 = arith.constant 2 : index
    %c4_60 = arith.constant 4 : index
    %123 = memref.load %arg4[%c2_59, %c4_60] : memref<4x12xf32, #tpu.memory_space<smem>>
    %124 = vector.broadcast %123 : f32 to vector<8x8xf32>
    %125 = arith.mulf %82, %124 : vector<8x8xf32>
    %126 = arith.addf %122, %125 : vector<8x8xf32>
    %c2_61 = arith.constant 2 : index
    %c5_62 = arith.constant 5 : index
    %127 = memref.load %arg4[%c2_61, %c5_62] : memref<4x12xf32, #tpu.memory_space<smem>>
    %128 = vector.broadcast %127 : f32 to vector<8x8xf32>
    %129 = arith.mulf %84, %128 : vector<8x8xf32>
    %130 = arith.addf %126, %129 : vector<8x8xf32>
    %131 = arith.addf %45, %119 : vector<8x8xf32>
    %132 = arith.addf %56, %130 : vector<8x8xf32>
    %c3_63 = arith.constant 3 : index
    %c1_64 = arith.constant 1 : index
    %133 = memref.load %arg2[%c3_63, %c1_64] : memref<4x4xf32, #tpu.memory_space<smem>>
    %134 = vector.broadcast %133 : f32 to vector<8x8xf32>
    %135 = arith.mulf %81, %134 : vector<8x8xf32>
    %c3_65 = arith.constant 3 : index
    %c3_66 = arith.constant 3 : index
    %136 = memref.load %arg4[%c3_65, %c3_66] : memref<4x12xf32, #tpu.memory_space<smem>>
    %137 = vector.broadcast %136 : f32 to vector<8x8xf32>
    %138 = arith.mulf %83, %137 : vector<8x8xf32>
    %c3_67 = arith.constant 3 : index
    %c4_68 = arith.constant 4 : index
    %139 = memref.load %arg4[%c3_67, %c4_68] : memref<4x12xf32, #tpu.memory_space<smem>>
    %140 = vector.broadcast %139 : f32 to vector<8x8xf32>
    %141 = arith.mulf %82, %140 : vector<8x8xf32>
    %142 = arith.addf %138, %141 : vector<8x8xf32>
    %c3_69 = arith.constant 3 : index
    %c5_70 = arith.constant 5 : index
    %143 = memref.load %arg4[%c3_69, %c5_70] : memref<4x12xf32, #tpu.memory_space<smem>>
    %144 = vector.broadcast %143 : f32 to vector<8x8xf32>
    %145 = arith.mulf %84, %144 : vector<8x8xf32>
    %146 = arith.addf %142, %145 : vector<8x8xf32>
    %147 = arith.addf %59, %135 : vector<8x8xf32>
    %148 = arith.addf %70, %146 : vector<8x8xf32>
    %c0_71 = arith.constant 0 : index
    %c2_72 = arith.constant 2 : index
    %c0_73 = arith.constant 0 : index
    %c0_74 = arith.constant 0 : index
    %149 = vector.load %arg7[%c0_71, %c2_72, %c0_73, %c0_74] : memref<1x4x8x32xf32, #tpu.memory_space<vmem>>, vector<1x1x8x32xf32>
    %150 = vector.shape_cast %149 : vector<1x1x8x32xf32> to vector<8x32xf32>
    %151 = vector.extract_strided_slice %150 {offsets = [0, 0], sizes = [8, 16], strides = [1, 1]} : vector<8x32xf32> to vector<8x16xf32>
    %152 = vector.extract_strided_slice %150 {offsets = [0, 16], sizes = [8, 16], strides = [1, 1]} : vector<8x32xf32> to vector<8x16xf32>
    %153 = arith.addf %151, %152 : vector<8x16xf32>
    %154 = vector.extract_strided_slice %150 {offsets = [0, 0], sizes = [8, 16], strides = [1, 1]} : vector<8x32xf32> to vector<8x16xf32>
    %155 = vector.extract_strided_slice %150 {offsets = [0, 16], sizes = [8, 16], strides = [1, 1]} : vector<8x32xf32> to vector<8x16xf32>
    %156 = arith.subf %154, %155 : vector<8x16xf32>
    %cst_75 = arith.constant dense<0.000000e+00> : vector<8x16xf32>
    %157 = tpu.matmul %153, %0, %cst_75 {dimension_numbers = #tpu.dot_dimension_numbers<[1], [0], [0], [1], [0, 0, 1, 1], [], []>, precision = #tpu.contract_precision<fp32>} : vector<8x16xf32>, vector<16x16xf32>, vector<8x16xf32> -> vector<8x16xf32>
    %cst_76 = arith.constant dense<0.000000e+00> : vector<8x16xf32>
    %158 = tpu.matmul %156, %0, %cst_76 {dimension_numbers = #tpu.dot_dimension_numbers<[1], [0], [0], [1], [0, 0, 1, 1], [], []>, precision = #tpu.contract_precision<fp32>} : vector<8x16xf32>, vector<16x16xf32>, vector<8x16xf32> -> vector<8x16xf32>
    %159 = vector.extract_strided_slice %157 {offsets = [0, 0], sizes = [8, 8], strides = [1, 1]} : vector<8x16xf32> to vector<8x8xf32>
    %160 = vector.extract_strided_slice %157 {offsets = [0, 8], sizes = [8, 8], strides = [1, 1]} : vector<8x16xf32> to vector<8x8xf32>
    %161 = vector.extract_strided_slice %158 {offsets = [0, 0], sizes = [8, 8], strides = [1, 1]} : vector<8x16xf32> to vector<8x8xf32>
    %162 = vector.extract_strided_slice %158 {offsets = [0, 8], sizes = [8, 8], strides = [1, 1]} : vector<8x16xf32> to vector<8x8xf32>
    %c0_77 = arith.constant 0 : index
    %c2_78 = arith.constant 2 : index
    %163 = memref.load %arg2[%c0_77, %c2_78] : memref<4x4xf32, #tpu.memory_space<smem>>
    %164 = vector.broadcast %163 : f32 to vector<8x8xf32>
    %165 = arith.mulf %159, %164 : vector<8x8xf32>
    %c0_79 = arith.constant 0 : index
    %c6 = arith.constant 6 : index
    %166 = memref.load %arg4[%c0_79, %c6] : memref<4x12xf32, #tpu.memory_space<smem>>
    %167 = vector.broadcast %166 : f32 to vector<8x8xf32>
    %168 = arith.mulf %161, %167 : vector<8x8xf32>
    %c0_80 = arith.constant 0 : index
    %c7 = arith.constant 7 : index
    %169 = memref.load %arg4[%c0_80, %c7] : memref<4x12xf32, #tpu.memory_space<smem>>
    %170 = vector.broadcast %169 : f32 to vector<8x8xf32>
    %171 = arith.mulf %160, %170 : vector<8x8xf32>
    %172 = arith.addf %168, %171 : vector<8x8xf32>
    %c0_81 = arith.constant 0 : index
    %c8 = arith.constant 8 : index
    %173 = memref.load %arg4[%c0_81, %c8] : memref<4x12xf32, #tpu.memory_space<smem>>
    %174 = vector.broadcast %173 : f32 to vector<8x8xf32>
    %175 = arith.mulf %162, %174 : vector<8x8xf32>
    %176 = arith.addf %172, %175 : vector<8x8xf32>
    %177 = arith.addf %99, %165 : vector<8x8xf32>
    %178 = arith.addf %100, %176 : vector<8x8xf32>
    %c1_82 = arith.constant 1 : index
    %c2_83 = arith.constant 2 : index
    %179 = memref.load %arg2[%c1_82, %c2_83] : memref<4x4xf32, #tpu.memory_space<smem>>
    %180 = vector.broadcast %179 : f32 to vector<8x8xf32>
    %181 = arith.mulf %159, %180 : vector<8x8xf32>
    %c1_84 = arith.constant 1 : index
    %c6_85 = arith.constant 6 : index
    %182 = memref.load %arg4[%c1_84, %c6_85] : memref<4x12xf32, #tpu.memory_space<smem>>
    %183 = vector.broadcast %182 : f32 to vector<8x8xf32>
    %184 = arith.mulf %161, %183 : vector<8x8xf32>
    %c1_86 = arith.constant 1 : index
    %c7_87 = arith.constant 7 : index
    %185 = memref.load %arg4[%c1_86, %c7_87] : memref<4x12xf32, #tpu.memory_space<smem>>
    %186 = vector.broadcast %185 : f32 to vector<8x8xf32>
    %187 = arith.mulf %160, %186 : vector<8x8xf32>
    %188 = arith.addf %184, %187 : vector<8x8xf32>
    %c1_88 = arith.constant 1 : index
    %c8_89 = arith.constant 8 : index
    %189 = memref.load %arg4[%c1_88, %c8_89] : memref<4x12xf32, #tpu.memory_space<smem>>
    %190 = vector.broadcast %189 : f32 to vector<8x8xf32>
    %191 = arith.mulf %162, %190 : vector<8x8xf32>
    %192 = arith.addf %188, %191 : vector<8x8xf32>
    %193 = arith.addf %115, %181 : vector<8x8xf32>
    %194 = arith.addf %116, %192 : vector<8x8xf32>
    %c2_90 = arith.constant 2 : index
    %c2_91 = arith.constant 2 : index
    %195 = memref.load %arg2[%c2_90, %c2_91] : memref<4x4xf32, #tpu.memory_space<smem>>
    %196 = vector.broadcast %195 : f32 to vector<8x8xf32>
    %197 = arith.mulf %159, %196 : vector<8x8xf32>
    %c2_92 = arith.constant 2 : index
    %c6_93 = arith.constant 6 : index
    %198 = memref.load %arg4[%c2_92, %c6_93] : memref<4x12xf32, #tpu.memory_space<smem>>
    %199 = vector.broadcast %198 : f32 to vector<8x8xf32>
    %200 = arith.mulf %161, %199 : vector<8x8xf32>
    %c2_94 = arith.constant 2 : index
    %c7_95 = arith.constant 7 : index
    %201 = memref.load %arg4[%c2_94, %c7_95] : memref<4x12xf32, #tpu.memory_space<smem>>
    %202 = vector.broadcast %201 : f32 to vector<8x8xf32>
    %203 = arith.mulf %160, %202 : vector<8x8xf32>
    %204 = arith.addf %200, %203 : vector<8x8xf32>
    %c2_96 = arith.constant 2 : index
    %c8_97 = arith.constant 8 : index
    %205 = memref.load %arg4[%c2_96, %c8_97] : memref<4x12xf32, #tpu.memory_space<smem>>
    %206 = vector.broadcast %205 : f32 to vector<8x8xf32>
    %207 = arith.mulf %162, %206 : vector<8x8xf32>
    %208 = arith.addf %204, %207 : vector<8x8xf32>
    %209 = arith.addf %131, %197 : vector<8x8xf32>
    %210 = arith.addf %132, %208 : vector<8x8xf32>
    %c3_98 = arith.constant 3 : index
    %c2_99 = arith.constant 2 : index
    %211 = memref.load %arg2[%c3_98, %c2_99] : memref<4x4xf32, #tpu.memory_space<smem>>
    %212 = vector.broadcast %211 : f32 to vector<8x8xf32>
    %213 = arith.mulf %159, %212 : vector<8x8xf32>
    %c3_100 = arith.constant 3 : index
    %c6_101 = arith.constant 6 : index
    %214 = memref.load %arg4[%c3_100, %c6_101] : memref<4x12xf32, #tpu.memory_space<smem>>
    %215 = vector.broadcast %214 : f32 to vector<8x8xf32>
    %216 = arith.mulf %161, %215 : vector<8x8xf32>
    %c3_102 = arith.constant 3 : index
    %c7_103 = arith.constant 7 : index
    %217 = memref.load %arg4[%c3_102, %c7_103] : memref<4x12xf32, #tpu.memory_space<smem>>
    %218 = vector.broadcast %217 : f32 to vector<8x8xf32>
    %219 = arith.mulf %160, %218 : vector<8x8xf32>
    %220 = arith.addf %216, %219 : vector<8x8xf32>
    %c3_104 = arith.constant 3 : index
    %c8_105 = arith.constant 8 : index
    %221 = memref.load %arg4[%c3_104, %c8_105] : memref<4x12xf32, #tpu.memory_space<smem>>
    %222 = vector.broadcast %221 : f32 to vector<8x8xf32>
    %223 = arith.mulf %162, %222 : vector<8x8xf32>
    %224 = arith.addf %220, %223 : vector<8x8xf32>
    %225 = arith.addf %147, %213 : vector<8x8xf32>
    %226 = arith.addf %148, %224 : vector<8x8xf32>
    %c0_106 = arith.constant 0 : index
    %c3_107 = arith.constant 3 : index
    %c0_108 = arith.constant 0 : index
    %c0_109 = arith.constant 0 : index
    %227 = vector.load %arg7[%c0_106, %c3_107, %c0_108, %c0_109] : memref<1x4x8x32xf32, #tpu.memory_space<vmem>>, vector<1x1x8x32xf32>
    %228 = vector.shape_cast %227 : vector<1x1x8x32xf32> to vector<8x32xf32>
    %229 = vector.extract_strided_slice %228 {offsets = [0, 0], sizes = [8, 16], strides = [1, 1]} : vector<8x32xf32> to vector<8x16xf32>
    %230 = vector.extract_strided_slice %228 {offsets = [0, 16], sizes = [8, 16], strides = [1, 1]} : vector<8x32xf32> to vector<8x16xf32>
    %231 = arith.addf %229, %230 : vector<8x16xf32>
    %232 = vector.extract_strided_slice %228 {offsets = [0, 0], sizes = [8, 16], strides = [1, 1]} : vector<8x32xf32> to vector<8x16xf32>
    %233 = vector.extract_strided_slice %228 {offsets = [0, 16], sizes = [8, 16], strides = [1, 1]} : vector<8x32xf32> to vector<8x16xf32>
    %234 = arith.subf %232, %233 : vector<8x16xf32>
    %cst_110 = arith.constant dense<0.000000e+00> : vector<8x16xf32>
    %235 = tpu.matmul %231, %0, %cst_110 {dimension_numbers = #tpu.dot_dimension_numbers<[1], [0], [0], [1], [0, 0, 1, 1], [], []>, precision = #tpu.contract_precision<fp32>} : vector<8x16xf32>, vector<16x16xf32>, vector<8x16xf32> -> vector<8x16xf32>
    %cst_111 = arith.constant dense<0.000000e+00> : vector<8x16xf32>
    %236 = tpu.matmul %234, %0, %cst_111 {dimension_numbers = #tpu.dot_dimension_numbers<[1], [0], [0], [1], [0, 0, 1, 1], [], []>, precision = #tpu.contract_precision<fp32>} : vector<8x16xf32>, vector<16x16xf32>, vector<8x16xf32> -> vector<8x16xf32>
    %237 = vector.extract_strided_slice %235 {offsets = [0, 0], sizes = [8, 8], strides = [1, 1]} : vector<8x16xf32> to vector<8x8xf32>
    %238 = vector.extract_strided_slice %235 {offsets = [0, 8], sizes = [8, 8], strides = [1, 1]} : vector<8x16xf32> to vector<8x8xf32>
    %239 = vector.extract_strided_slice %236 {offsets = [0, 0], sizes = [8, 8], strides = [1, 1]} : vector<8x16xf32> to vector<8x8xf32>
    %240 = vector.extract_strided_slice %236 {offsets = [0, 8], sizes = [8, 8], strides = [1, 1]} : vector<8x16xf32> to vector<8x8xf32>
    %c0_112 = arith.constant 0 : index
    %c3_113 = arith.constant 3 : index
    %241 = memref.load %arg2[%c0_112, %c3_113] : memref<4x4xf32, #tpu.memory_space<smem>>
    %242 = vector.broadcast %241 : f32 to vector<8x8xf32>
    %243 = arith.mulf %237, %242 : vector<8x8xf32>
    %c0_114 = arith.constant 0 : index
    %c9 = arith.constant 9 : index
    %244 = memref.load %arg4[%c0_114, %c9] : memref<4x12xf32, #tpu.memory_space<smem>>
    %245 = vector.broadcast %244 : f32 to vector<8x8xf32>
    %246 = arith.mulf %239, %245 : vector<8x8xf32>
    %c0_115 = arith.constant 0 : index
    %c10 = arith.constant 10 : index
    %247 = memref.load %arg4[%c0_115, %c10] : memref<4x12xf32, #tpu.memory_space<smem>>
    %248 = vector.broadcast %247 : f32 to vector<8x8xf32>
    %249 = arith.mulf %238, %248 : vector<8x8xf32>
    %250 = arith.addf %246, %249 : vector<8x8xf32>
    %c0_116 = arith.constant 0 : index
    %c11 = arith.constant 11 : index
    %251 = memref.load %arg4[%c0_116, %c11] : memref<4x12xf32, #tpu.memory_space<smem>>
    %252 = vector.broadcast %251 : f32 to vector<8x8xf32>
    %253 = arith.mulf %240, %252 : vector<8x8xf32>
    %254 = arith.addf %250, %253 : vector<8x8xf32>
    %255 = arith.addf %177, %243 : vector<8x8xf32>
    %256 = arith.addf %178, %254 : vector<8x8xf32>
    %c1_117 = arith.constant 1 : index
    %c3_118 = arith.constant 3 : index
    %257 = memref.load %arg2[%c1_117, %c3_118] : memref<4x4xf32, #tpu.memory_space<smem>>
    %258 = vector.broadcast %257 : f32 to vector<8x8xf32>
    %259 = arith.mulf %237, %258 : vector<8x8xf32>
    %c1_119 = arith.constant 1 : index
    %c9_120 = arith.constant 9 : index
    %260 = memref.load %arg4[%c1_119, %c9_120] : memref<4x12xf32, #tpu.memory_space<smem>>
    %261 = vector.broadcast %260 : f32 to vector<8x8xf32>
    %262 = arith.mulf %239, %261 : vector<8x8xf32>
    %c1_121 = arith.constant 1 : index
    %c10_122 = arith.constant 10 : index
    %263 = memref.load %arg4[%c1_121, %c10_122] : memref<4x12xf32, #tpu.memory_space<smem>>
    %264 = vector.broadcast %263 : f32 to vector<8x8xf32>
    %265 = arith.mulf %238, %264 : vector<8x8xf32>
    %266 = arith.addf %262, %265 : vector<8x8xf32>
    %c1_123 = arith.constant 1 : index
    %c11_124 = arith.constant 11 : index
    %267 = memref.load %arg4[%c1_123, %c11_124] : memref<4x12xf32, #tpu.memory_space<smem>>
    %268 = vector.broadcast %267 : f32 to vector<8x8xf32>
    %269 = arith.mulf %240, %268 : vector<8x8xf32>
    %270 = arith.addf %266, %269 : vector<8x8xf32>
    %271 = arith.addf %193, %259 : vector<8x8xf32>
    %272 = arith.addf %194, %270 : vector<8x8xf32>
    %c2_125 = arith.constant 2 : index
    %c3_126 = arith.constant 3 : index
    %273 = memref.load %arg2[%c2_125, %c3_126] : memref<4x4xf32, #tpu.memory_space<smem>>
    %274 = vector.broadcast %273 : f32 to vector<8x8xf32>
    %275 = arith.mulf %237, %274 : vector<8x8xf32>
    %c2_127 = arith.constant 2 : index
    %c9_128 = arith.constant 9 : index
    %276 = memref.load %arg4[%c2_127, %c9_128] : memref<4x12xf32, #tpu.memory_space<smem>>
    %277 = vector.broadcast %276 : f32 to vector<8x8xf32>
    %278 = arith.mulf %239, %277 : vector<8x8xf32>
    %c2_129 = arith.constant 2 : index
    %c10_130 = arith.constant 10 : index
    %279 = memref.load %arg4[%c2_129, %c10_130] : memref<4x12xf32, #tpu.memory_space<smem>>
    %280 = vector.broadcast %279 : f32 to vector<8x8xf32>
    %281 = arith.mulf %238, %280 : vector<8x8xf32>
    %282 = arith.addf %278, %281 : vector<8x8xf32>
    %c2_131 = arith.constant 2 : index
    %c11_132 = arith.constant 11 : index
    %283 = memref.load %arg4[%c2_131, %c11_132] : memref<4x12xf32, #tpu.memory_space<smem>>
    %284 = vector.broadcast %283 : f32 to vector<8x8xf32>
    %285 = arith.mulf %240, %284 : vector<8x8xf32>
    %286 = arith.addf %282, %285 : vector<8x8xf32>
    %287 = arith.addf %209, %275 : vector<8x8xf32>
    %288 = arith.addf %210, %286 : vector<8x8xf32>
    %c3_133 = arith.constant 3 : index
    %c3_134 = arith.constant 3 : index
    %289 = memref.load %arg2[%c3_133, %c3_134] : memref<4x4xf32, #tpu.memory_space<smem>>
    %290 = vector.broadcast %289 : f32 to vector<8x8xf32>
    %291 = arith.mulf %237, %290 : vector<8x8xf32>
    %c3_135 = arith.constant 3 : index
    %c9_136 = arith.constant 9 : index
    %292 = memref.load %arg4[%c3_135, %c9_136] : memref<4x12xf32, #tpu.memory_space<smem>>
    %293 = vector.broadcast %292 : f32 to vector<8x8xf32>
    %294 = arith.mulf %239, %293 : vector<8x8xf32>
    %c3_137 = arith.constant 3 : index
    %c10_138 = arith.constant 10 : index
    %295 = memref.load %arg4[%c3_137, %c10_138] : memref<4x12xf32, #tpu.memory_space<smem>>
    %296 = vector.broadcast %295 : f32 to vector<8x8xf32>
    %297 = arith.mulf %238, %296 : vector<8x8xf32>
    %298 = arith.addf %294, %297 : vector<8x8xf32>
    %c3_139 = arith.constant 3 : index
    %c11_140 = arith.constant 11 : index
    %299 = memref.load %arg4[%c3_139, %c11_140] : memref<4x12xf32, #tpu.memory_space<smem>>
    %300 = vector.broadcast %299 : f32 to vector<8x8xf32>
    %301 = arith.mulf %240, %300 : vector<8x8xf32>
    %302 = arith.addf %298, %301 : vector<8x8xf32>
    %303 = arith.addf %225, %291 : vector<8x8xf32>
    %304 = arith.addf %226, %302 : vector<8x8xf32>
    %c0_141 = arith.constant 0 : index
    %305 = memref.load %arg3[%c0_141] : memref<4xf32, #tpu.memory_space<smem>>
    %306 = vector.broadcast %305 : f32 to vector<8x8xf32>
    %307 = arith.addf %255, %306 : vector<8x8xf32>
    %c1_142 = arith.constant 1 : index
    %308 = memref.load %arg3[%c1_142] : memref<4xf32, #tpu.memory_space<smem>>
    %309 = vector.broadcast %308 : f32 to vector<8x8xf32>
    %310 = arith.addf %271, %309 : vector<8x8xf32>
    %c2_143 = arith.constant 2 : index
    %311 = memref.load %arg3[%c2_143] : memref<4xf32, #tpu.memory_space<smem>>
    %312 = vector.broadcast %311 : f32 to vector<8x8xf32>
    %313 = arith.addf %287, %312 : vector<8x8xf32>
    %c3_144 = arith.constant 3 : index
    %314 = memref.load %arg3[%c3_144] : memref<4xf32, #tpu.memory_space<smem>>
    %315 = vector.broadcast %314 : f32 to vector<8x8xf32>
    %316 = arith.addf %303, %315 : vector<8x8xf32>
    %317 = vector.shape_cast %307 : vector<8x8xf32> to vector<1x8x8xf32>
    %318 = vector.shape_cast %310 : vector<8x8xf32> to vector<1x8x8xf32>
    %319 = vector.shape_cast %313 : vector<8x8xf32> to vector<1x8x8xf32>
    %320 = vector.shape_cast %316 : vector<8x8xf32> to vector<1x8x8xf32>
    %321 = tpu.concatenate %317, %318, %319, %320 in 0 : vector<1x8x8xf32>, vector<1x8x8xf32>, vector<1x8x8xf32>, vector<1x8x8xf32> -> vector<4x8x8xf32>
    %c0_145 = arith.constant 0 : index
    %322 = memref.load %arg5[%c0_145] : memref<4xf32, #tpu.memory_space<smem>>
    %323 = vector.broadcast %322 : f32 to vector<8x8xf32>
    %324 = arith.addf %256, %323 : vector<8x8xf32>
    %c1_146 = arith.constant 1 : index
    %325 = memref.load %arg5[%c1_146] : memref<4xf32, #tpu.memory_space<smem>>
    %326 = vector.broadcast %325 : f32 to vector<8x8xf32>
    %327 = arith.addf %272, %326 : vector<8x8xf32>
    %c2_147 = arith.constant 2 : index
    %328 = memref.load %arg5[%c2_147] : memref<4xf32, #tpu.memory_space<smem>>
    %329 = vector.broadcast %328 : f32 to vector<8x8xf32>
    %330 = arith.addf %288, %329 : vector<8x8xf32>
    %c3_148 = arith.constant 3 : index
    %331 = memref.load %arg5[%c3_148] : memref<4xf32, #tpu.memory_space<smem>>
    %332 = vector.broadcast %331 : f32 to vector<8x8xf32>
    %333 = arith.addf %304, %332 : vector<8x8xf32>
    %334 = vector.shape_cast %324 : vector<8x8xf32> to vector<1x8x8xf32>
    %335 = vector.shape_cast %327 : vector<8x8xf32> to vector<1x8x8xf32>
    %336 = vector.shape_cast %330 : vector<8x8xf32> to vector<1x8x8xf32>
    %337 = vector.shape_cast %333 : vector<8x8xf32> to vector<1x8x8xf32>
    %338 = tpu.concatenate %334, %335, %336, %337 in 0 : vector<1x8x8xf32>, vector<1x8x8xf32>, vector<1x8x8xf32>, vector<1x8x8xf32> -> vector<4x8x8xf32>
    %339 = arith.truncf %321 : vector<4x8x8xf32> to vector<4x8x8xbf16>
    %c0_149 = arith.constant 0 : index
    %c0_150 = arith.constant 0 : index
    %c0_151 = arith.constant 0 : index
    %c0_152 = arith.constant 0 : index
    %340 = vector.load %arg8[%c0_149, %c0_150, %c0_151, %c0_152] : memref<1x4x8x8xbf16, #tpu.memory_space<vmem>>, vector<1x4x8x8xbf16>
    %341 = vector.shape_cast %340 : vector<1x4x8x8xbf16> to vector<4x8x8xbf16>
    %342 = vector.shape_cast %339 : vector<4x8x8xbf16> to vector<1x4x8x8xbf16>
    tpu.vector_store %arg8[%c0_149, %c0_150, %c0_151, %c0_152], %342 {strides = array<i32>} : memref<1x4x8x8xbf16, #tpu.memory_space<vmem>>, vector<1x4x8x8xbf16>,
    %343 = arith.truncf %338 : vector<4x8x8xf32> to vector<4x8x8xbf16>
    %c0_153 = arith.constant 0 : index
    %c0_154 = arith.constant 0 : index
    %c0_155 = arith.constant 0 : index
    %c0_156 = arith.constant 0 : index
    %344 = vector.load %arg9[%c0_153, %c0_154, %c0_155, %c0_156] : memref<1x4x8x8xbf16, #tpu.memory_space<vmem>>, vector<1x4x8x8xbf16>
    %345 = vector.shape_cast %344 : vector<1x4x8x8xbf16> to vector<4x8x8xbf16>
    %346 = vector.shape_cast %343 : vector<4x8x8xbf16> to vector<1x4x8x8xbf16>
    tpu.vector_store %arg9[%c0_153, %c0_154, %c0_155, %c0_156], %346 {strides = array<i32>} : memref<1x4x8x8xbf16, #tpu.memory_space<vmem>>, vector<1x4x8x8xbf16>,
    %cst_157 = arith.constant dense<0.000000e+00> : vector<4x8xf32>
    %347 = vector.multi_reduction <add>, %321, %cst_157 [2] : vector<4x8x8xf32> to vector<4x8xf32>
    %cst_158 = arith.constant dense<0.000000e+00> : vector<4xf32>
    %348 = vector.multi_reduction <add>, %347, %cst_158 [1] : vector<4x8xf32> to vector<4xf32>
    %349 = arith.mulf %321, %321 : vector<4x8x8xf32>
    %cst_159 = arith.constant dense<0.000000e+00> : vector<4x8xf32>
    %350 = vector.multi_reduction <add>, %349, %cst_159 [2] : vector<4x8x8xf32> to vector<4x8xf32>
    %cst_160 = arith.constant dense<0.000000e+00> : vector<4xf32>
    %351 = vector.multi_reduction <add>, %350, %cst_160 [1] : vector<4x8xf32> to vector<4xf32>
    %cst_161 = arith.constant dense<0.000000e+00> : vector<4x8xf32>
    %352 = vector.multi_reduction <add>, %338, %cst_161 [2] : vector<4x8x8xf32> to vector<4x8xf32>
    %cst_162 = arith.constant dense<0.000000e+00> : vector<4xf32>
    %353 = vector.multi_reduction <add>, %352, %cst_162 [1] : vector<4x8xf32> to vector<4xf32>
    %354 = arith.mulf %338, %338 : vector<4x8x8xf32>
    %cst_163 = arith.constant dense<0.000000e+00> : vector<4x8xf32>
    %355 = vector.multi_reduction <add>, %354, %cst_163 [2] : vector<4x8x8xf32> to vector<4x8xf32>
    %cst_164 = arith.constant dense<0.000000e+00> : vector<4xf32>
    %356 = vector.multi_reduction <add>, %355, %cst_164 [1] : vector<4x8xf32> to vector<4xf32>
    %357 = vector.shape_cast %348 : vector<4xf32> to vector<1x4xf32>
    %358 = vector.shape_cast %351 : vector<4xf32> to vector<1x4xf32>
    %359 = vector.shape_cast %353 : vector<4xf32> to vector<1x4xf32>
    %360 = vector.shape_cast %356 : vector<4xf32> to vector<1x4xf32>
    %361 = tpu.concatenate %357, %358, %359, %360 in 0 : vector<1x4xf32>, vector<1x4xf32>, vector<1x4xf32>, vector<1x4xf32> -> vector<4x4xf32>
    %c0_165 = arith.constant 0 : index
    %c0_166 = arith.constant 0 : index
    %c0_167 = arith.constant 0 : index
    %c0_168 = arith.constant 0 : index
    %362 = vector.load %arg10[%c0_165, %c0_166, %c0_167, %c0_168] : memref<1x1x4x4xf32, #tpu.memory_space<vmem>>, vector<1x1x4x4xf32>
    %363 = vector.shape_cast %362 : vector<1x1x4x4xf32> to vector<4x4xf32>
    %364 = vector.shape_cast %361 : vector<4x4xf32> to vector<1x1x4x4xf32>
    tpu.vector_store %arg10[%c0_165, %c0_166, %c0_167, %c0_168], %364 {strides = array<i32>} : memref<1x1x4x4xf32, #tpu.memory_space<vmem>>, vector<1x1x4x4xf32>,
    return
  }
  func.func @transform_0(%arg0: i32, %arg1: i32) -> (i32, i32) {
    %c0_i32 = arith.constant 0 : i32
    %c0_i32_0 = arith.constant 0 : i32
    %c0_i32_1 = arith.constant 0 : i32
    return %c0_i32, %c0_i32_0 : i32, i32
  }
  func.func @transform_1(%arg0: i32, %arg1: i32) -> i32 {
    %c0_i32 = arith.constant 0 : i32
    %c0_i32_0 = arith.constant 0 : i32
    return %c0_i32 : i32
  }
  func.func @transform_2(%arg0: i32, %arg1: i32) -> (i32, i32) {
    %c0_i32 = arith.constant 0 : i32
    %c0_i32_0 = arith.constant 0 : i32
    %c0_i32_1 = arith.constant 0 : i32
    return %c0_i32, %c0_i32_0 : i32, i32
  }
  func.func @transform_3(%arg0: i32, %arg1: i32) -> i32 {
    %c0_i32 = arith.constant 0 : i32
    %c0_i32_0 = arith.constant 0 : i32
    return %c0_i32 : i32
  }
  func.func @transform_4(%arg0: i32, %arg1: i32) -> (i32, i32) {
    %c0_i32 = arith.constant 0 : i32
    %c0_i32_0 = arith.constant 0 : i32
    %c0_i32_1 = arith.constant 0 : i32
    return %c0_i32, %c0_i32_0 : i32, i32
  }
  func.func @transform_5(%arg0: i32, %arg1: i32) -> (i32, i32, i32, i32) {
    %c0_i32 = arith.constant 0 : i32
    %c0_i32_0 = arith.constant 0 : i32
    %c0_i32_1 = arith.constant 0 : i32
    return %arg0, %c0_i32, %arg1, %c0_i32_0 : i32, i32, i32, i32
  }
  func.func @transform_6(%arg0: i32, %arg1: i32) -> (i32, i32, i32, i32) {
    %c0_i32 = arith.constant 0 : i32
    %c0_i32_0 = arith.constant 0 : i32
    %c0_i32_1 = arith.constant 0 : i32
    return %arg0, %c0_i32, %arg1, %c0_i32_0 : i32, i32, i32, i32
  }
  func.func @transform_7(%arg0: i32, %arg1: i32) -> (i32, i32, i32, i32) {
    %c0_i32 = arith.constant 0 : i32
    %c0_i32_0 = arith.constant 0 : i32
    %c0_i32_1 = arith.constant 0 : i32
    return %arg0, %c0_i32, %arg1, %c0_i32_0 : i32, i32, i32, i32
  }
  func.func @transform_8(%arg0: i32, %arg1: i32) -> (i32, i32, i32, i32) {
    %c0_i32 = arith.constant 0 : i32
    %c0_i32_0 = arith.constant 0 : i32
    %c0_i32_1 = arith.constant 0 : i32
    return %arg0, %arg1, %c0_i32, %c0_i32_0 : i32, i32, i32, i32
  }
}

module attributes {stable_mosaic.version = 11 : i64} {
  func.func @_wt_pass2_kernel(%arg0: i32, %arg1: i32, %arg2: memref<4xf32, #tpu.memory_space<smem>>, %arg3: memref<4xf32, #tpu.memory_space<smem>>, %arg4: memref<4xf32, #tpu.memory_space<smem>>, %arg5: memref<4xf32, #tpu.memory_space<smem>>, %arg6: memref<1x4x8x8xbf16, #tpu.memory_space<vmem>>, %arg7: memref<1x4x8x8xbf16, #tpu.memory_space<vmem>>, %arg8: memref<1x4x8x8xf32, #tpu.memory_space<vmem>>, %arg9: memref<1x4x8x8xf32, #tpu.memory_space<vmem>>) attributes {dimension_semantics = [#tpu.dimension_semantics<parallel>, #tpu.dimension_semantics<parallel>], iteration_bounds = array<i64: 2, 1>, scalar_prefetch = 0 : i64, scratch_operands = 0 : i64, tpu.core_type = #tpu.core_type<tc>, window_params = [{transform_indices = @transform_0, window_bounds = array<i64: 4>}, {transform_indices = @transform_1, window_bounds = array<i64: 4>}, {transform_indices = @transform_2, window_bounds = array<i64: 4>}, {transform_indices = @transform_3, window_bounds = array<i64: 4>}, {transform_indices = @transform_4, window_bounds = array<i64: 1, 4, 8, 8>}, {transform_indices = @transform_5, window_bounds = array<i64: 1, 4, 8, 8>}, {transform_indices = @transform_6, window_bounds = array<i64: 1, 4, 8, 8>}, {transform_indices = @transform_7, window_bounds = array<i64: 1, 4, 8, 8>}]} {
    %c0 = arith.constant 0 : index
    %c0_0 = arith.constant 0 : index
    %c0_1 = arith.constant 0 : index
    %c0_2 = arith.constant 0 : index
    %0 = vector.load %arg6[%c0, %c0_0, %c0_1, %c0_2] : memref<1x4x8x8xbf16, #tpu.memory_space<vmem>>, vector<1x1x8x8xbf16>
    %1 = vector.shape_cast %0 : vector<1x1x8x8xbf16> to vector<8x8xbf16>
    %2 = arith.extf %1 : vector<8x8xbf16> to vector<8x8xf32>
    %c0_3 = arith.constant 0 : index
    %3 = memref.load %arg2[%c0_3] : memref<4xf32, #tpu.memory_space<smem>>
    %4 = vector.broadcast %3 : f32 to vector<8x8xf32>
    %5 = arith.mulf %2, %4 : vector<8x8xf32>
    %c0_4 = arith.constant 0 : index
    %6 = memref.load %arg3[%c0_4] : memref<4xf32, #tpu.memory_space<smem>>
    %7 = vector.broadcast %6 : f32 to vector<8x8xf32>
    %8 = arith.addf %5, %7 : vector<8x8xf32>
    %cst = arith.constant 0.000000e+00 : f32
    %cst_5 = arith.constant 6.000000e+00 : f32
    %9 = vector.broadcast %cst : f32 to vector<8x8xf32>
    %10 = arith.maximumf %9, %8 : vector<8x8xf32>
    %11 = vector.broadcast %cst_5 : f32 to vector<8x8xf32>
    %12 = arith.minimumf %11, %10 : vector<8x8xf32>
    %c0_6 = arith.constant 0 : index
    %c0_7 = arith.constant 0 : index
    %c0_8 = arith.constant 0 : index
    %c0_9 = arith.constant 0 : index
    %13 = vector.load %arg8[%c0_6, %c0_7, %c0_8, %c0_9] : memref<1x4x8x8xf32, #tpu.memory_space<vmem>>, vector<1x1x8x8xf32>
    %14 = vector.shape_cast %13 : vector<1x1x8x8xf32> to vector<8x8xf32>
    %15 = vector.shape_cast %12 : vector<8x8xf32> to vector<1x1x8x8xf32>
    tpu.vector_store %arg8[%c0_6, %c0_7, %c0_8, %c0_9], %15 {strides = array<i32>} : memref<1x4x8x8xf32, #tpu.memory_space<vmem>>, vector<1x1x8x8xf32>,
    %c0_10 = arith.constant 0 : index
    %c0_11 = arith.constant 0 : index
    %c0_12 = arith.constant 0 : index
    %c0_13 = arith.constant 0 : index
    %16 = vector.load %arg7[%c0_10, %c0_11, %c0_12, %c0_13] : memref<1x4x8x8xbf16, #tpu.memory_space<vmem>>, vector<1x1x8x8xbf16>
    %17 = vector.shape_cast %16 : vector<1x1x8x8xbf16> to vector<8x8xbf16>
    %18 = arith.extf %17 : vector<8x8xbf16> to vector<8x8xf32>
    %c0_14 = arith.constant 0 : index
    %19 = memref.load %arg4[%c0_14] : memref<4xf32, #tpu.memory_space<smem>>
    %20 = vector.broadcast %19 : f32 to vector<8x8xf32>
    %21 = arith.mulf %18, %20 : vector<8x8xf32>
    %c0_15 = arith.constant 0 : index
    %22 = memref.load %arg5[%c0_15] : memref<4xf32, #tpu.memory_space<smem>>
    %23 = vector.broadcast %22 : f32 to vector<8x8xf32>
    %24 = arith.addf %21, %23 : vector<8x8xf32>
    %cst_16 = arith.constant 0.000000e+00 : f32
    %cst_17 = arith.constant 6.000000e+00 : f32
    %25 = vector.broadcast %cst_16 : f32 to vector<8x8xf32>
    %26 = arith.maximumf %25, %24 : vector<8x8xf32>
    %27 = vector.broadcast %cst_17 : f32 to vector<8x8xf32>
    %28 = arith.minimumf %27, %26 : vector<8x8xf32>
    %c0_18 = arith.constant 0 : index
    %c0_19 = arith.constant 0 : index
    %c0_20 = arith.constant 0 : index
    %c0_21 = arith.constant 0 : index
    %29 = vector.load %arg9[%c0_18, %c0_19, %c0_20, %c0_21] : memref<1x4x8x8xf32, #tpu.memory_space<vmem>>, vector<1x1x8x8xf32>
    %30 = vector.shape_cast %29 : vector<1x1x8x8xf32> to vector<8x8xf32>
    %31 = vector.shape_cast %28 : vector<8x8xf32> to vector<1x1x8x8xf32>
    tpu.vector_store %arg9[%c0_18, %c0_19, %c0_20, %c0_21], %31 {strides = array<i32>} : memref<1x4x8x8xf32, #tpu.memory_space<vmem>>, vector<1x1x8x8xf32>,
    %c0_22 = arith.constant 0 : index
    %c1 = arith.constant 1 : index
    %c0_23 = arith.constant 0 : index
    %c0_24 = arith.constant 0 : index
    %32 = vector.load %arg6[%c0_22, %c1, %c0_23, %c0_24] : memref<1x4x8x8xbf16, #tpu.memory_space<vmem>>, vector<1x1x8x8xbf16>
    %33 = vector.shape_cast %32 : vector<1x1x8x8xbf16> to vector<8x8xbf16>
    %34 = arith.extf %33 : vector<8x8xbf16> to vector<8x8xf32>
    %c1_25 = arith.constant 1 : index
    %35 = memref.load %arg2[%c1_25] : memref<4xf32, #tpu.memory_space<smem>>
    %36 = vector.broadcast %35 : f32 to vector<8x8xf32>
    %37 = arith.mulf %34, %36 : vector<8x8xf32>
    %c1_26 = arith.constant 1 : index
    %38 = memref.load %arg3[%c1_26] : memref<4xf32, #tpu.memory_space<smem>>
    %39 = vector.broadcast %38 : f32 to vector<8x8xf32>
    %40 = arith.addf %37, %39 : vector<8x8xf32>
    %cst_27 = arith.constant 0.000000e+00 : f32
    %cst_28 = arith.constant 6.000000e+00 : f32
    %41 = vector.broadcast %cst_27 : f32 to vector<8x8xf32>
    %42 = arith.maximumf %41, %40 : vector<8x8xf32>
    %43 = vector.broadcast %cst_28 : f32 to vector<8x8xf32>
    %44 = arith.minimumf %43, %42 : vector<8x8xf32>
    %c0_29 = arith.constant 0 : index
    %c1_30 = arith.constant 1 : index
    %c0_31 = arith.constant 0 : index
    %c0_32 = arith.constant 0 : index
    %45 = vector.load %arg8[%c0_29, %c1_30, %c0_31, %c0_32] : memref<1x4x8x8xf32, #tpu.memory_space<vmem>>, vector<1x1x8x8xf32>
    %46 = vector.shape_cast %45 : vector<1x1x8x8xf32> to vector<8x8xf32>
    %47 = vector.shape_cast %44 : vector<8x8xf32> to vector<1x1x8x8xf32>
    tpu.vector_store %arg8[%c0_29, %c1_30, %c0_31, %c0_32], %47 {strides = array<i32>} : memref<1x4x8x8xf32, #tpu.memory_space<vmem>>, vector<1x1x8x8xf32>,
    %c0_33 = arith.constant 0 : index
    %c1_34 = arith.constant 1 : index
    %c0_35 = arith.constant 0 : index
    %c0_36 = arith.constant 0 : index
    %48 = vector.load %arg7[%c0_33, %c1_34, %c0_35, %c0_36] : memref<1x4x8x8xbf16, #tpu.memory_space<vmem>>, vector<1x1x8x8xbf16>
    %49 = vector.shape_cast %48 : vector<1x1x8x8xbf16> to vector<8x8xbf16>
    %50 = arith.extf %49 : vector<8x8xbf16> to vector<8x8xf32>
    %c1_37 = arith.constant 1 : index
    %51 = memref.load %arg4[%c1_37] : memref<4xf32, #tpu.memory_space<smem>>
    %52 = vector.broadcast %51 : f32 to vector<8x8xf32>
    %53 = arith.mulf %50, %52 : vector<8x8xf32>
    %c1_38 = arith.constant 1 : index
    %54 = memref.load %arg5[%c1_38] : memref<4xf32, #tpu.memory_space<smem>>
    %55 = vector.broadcast %54 : f32 to vector<8x8xf32>
    %56 = arith.addf %53, %55 : vector<8x8xf32>
    %cst_39 = arith.constant 0.000000e+00 : f32
    %cst_40 = arith.constant 6.000000e+00 : f32
    %57 = vector.broadcast %cst_39 : f32 to vector<8x8xf32>
    %58 = arith.maximumf %57, %56 : vector<8x8xf32>
    %59 = vector.broadcast %cst_40 : f32 to vector<8x8xf32>
    %60 = arith.minimumf %59, %58 : vector<8x8xf32>
    %c0_41 = arith.constant 0 : index
    %c1_42 = arith.constant 1 : index
    %c0_43 = arith.constant 0 : index
    %c0_44 = arith.constant 0 : index
    %61 = vector.load %arg9[%c0_41, %c1_42, %c0_43, %c0_44] : memref<1x4x8x8xf32, #tpu.memory_space<vmem>>, vector<1x1x8x8xf32>
    %62 = vector.shape_cast %61 : vector<1x1x8x8xf32> to vector<8x8xf32>
    %63 = vector.shape_cast %60 : vector<8x8xf32> to vector<1x1x8x8xf32>
    tpu.vector_store %arg9[%c0_41, %c1_42, %c0_43, %c0_44], %63 {strides = array<i32>} : memref<1x4x8x8xf32, #tpu.memory_space<vmem>>, vector<1x1x8x8xf32>,
    %c0_45 = arith.constant 0 : index
    %c2 = arith.constant 2 : index
    %c0_46 = arith.constant 0 : index
    %c0_47 = arith.constant 0 : index
    %64 = vector.load %arg6[%c0_45, %c2, %c0_46, %c0_47] : memref<1x4x8x8xbf16, #tpu.memory_space<vmem>>, vector<1x1x8x8xbf16>
    %65 = vector.shape_cast %64 : vector<1x1x8x8xbf16> to vector<8x8xbf16>
    %66 = arith.extf %65 : vector<8x8xbf16> to vector<8x8xf32>
    %c2_48 = arith.constant 2 : index
    %67 = memref.load %arg2[%c2_48] : memref<4xf32, #tpu.memory_space<smem>>
    %68 = vector.broadcast %67 : f32 to vector<8x8xf32>
    %69 = arith.mulf %66, %68 : vector<8x8xf32>
    %c2_49 = arith.constant 2 : index
    %70 = memref.load %arg3[%c2_49] : memref<4xf32, #tpu.memory_space<smem>>
    %71 = vector.broadcast %70 : f32 to vector<8x8xf32>
    %72 = arith.addf %69, %71 : vector<8x8xf32>
    %cst_50 = arith.constant 0.000000e+00 : f32
    %cst_51 = arith.constant 6.000000e+00 : f32
    %73 = vector.broadcast %cst_50 : f32 to vector<8x8xf32>
    %74 = arith.maximumf %73, %72 : vector<8x8xf32>
    %75 = vector.broadcast %cst_51 : f32 to vector<8x8xf32>
    %76 = arith.minimumf %75, %74 : vector<8x8xf32>
    %c0_52 = arith.constant 0 : index
    %c2_53 = arith.constant 2 : index
    %c0_54 = arith.constant 0 : index
    %c0_55 = arith.constant 0 : index
    %77 = vector.load %arg8[%c0_52, %c2_53, %c0_54, %c0_55] : memref<1x4x8x8xf32, #tpu.memory_space<vmem>>, vector<1x1x8x8xf32>
    %78 = vector.shape_cast %77 : vector<1x1x8x8xf32> to vector<8x8xf32>
    %79 = vector.shape_cast %76 : vector<8x8xf32> to vector<1x1x8x8xf32>
    tpu.vector_store %arg8[%c0_52, %c2_53, %c0_54, %c0_55], %79 {strides = array<i32>} : memref<1x4x8x8xf32, #tpu.memory_space<vmem>>, vector<1x1x8x8xf32>,
    %c0_56 = arith.constant 0 : index
    %c2_57 = arith.constant 2 : index
    %c0_58 = arith.constant 0 : index
    %c0_59 = arith.constant 0 : index
    %80 = vector.load %arg7[%c0_56, %c2_57, %c0_58, %c0_59] : memref<1x4x8x8xbf16, #tpu.memory_space<vmem>>, vector<1x1x8x8xbf16>
    %81 = vector.shape_cast %80 : vector<1x1x8x8xbf16> to vector<8x8xbf16>
    %82 = arith.extf %81 : vector<8x8xbf16> to vector<8x8xf32>
    %c2_60 = arith.constant 2 : index
    %83 = memref.load %arg4[%c2_60] : memref<4xf32, #tpu.memory_space<smem>>
    %84 = vector.broadcast %83 : f32 to vector<8x8xf32>
    %85 = arith.mulf %82, %84 : vector<8x8xf32>
    %c2_61 = arith.constant 2 : index
    %86 = memref.load %arg5[%c2_61] : memref<4xf32, #tpu.memory_space<smem>>
    %87 = vector.broadcast %86 : f32 to vector<8x8xf32>
    %88 = arith.addf %85, %87 : vector<8x8xf32>
    %cst_62 = arith.constant 0.000000e+00 : f32
    %cst_63 = arith.constant 6.000000e+00 : f32
    %89 = vector.broadcast %cst_62 : f32 to vector<8x8xf32>
    %90 = arith.maximumf %89, %88 : vector<8x8xf32>
    %91 = vector.broadcast %cst_63 : f32 to vector<8x8xf32>
    %92 = arith.minimumf %91, %90 : vector<8x8xf32>
    %c0_64 = arith.constant 0 : index
    %c2_65 = arith.constant 2 : index
    %c0_66 = arith.constant 0 : index
    %c0_67 = arith.constant 0 : index
    %93 = vector.load %arg9[%c0_64, %c2_65, %c0_66, %c0_67] : memref<1x4x8x8xf32, #tpu.memory_space<vmem>>, vector<1x1x8x8xf32>
    %94 = vector.shape_cast %93 : vector<1x1x8x8xf32> to vector<8x8xf32>
    %95 = vector.shape_cast %92 : vector<8x8xf32> to vector<1x1x8x8xf32>
    tpu.vector_store %arg9[%c0_64, %c2_65, %c0_66, %c0_67], %95 {strides = array<i32>} : memref<1x4x8x8xf32, #tpu.memory_space<vmem>>, vector<1x1x8x8xf32>,
    %c0_68 = arith.constant 0 : index
    %c3 = arith.constant 3 : index
    %c0_69 = arith.constant 0 : index
    %c0_70 = arith.constant 0 : index
    %96 = vector.load %arg6[%c0_68, %c3, %c0_69, %c0_70] : memref<1x4x8x8xbf16, #tpu.memory_space<vmem>>, vector<1x1x8x8xbf16>
    %97 = vector.shape_cast %96 : vector<1x1x8x8xbf16> to vector<8x8xbf16>
    %98 = arith.extf %97 : vector<8x8xbf16> to vector<8x8xf32>
    %c3_71 = arith.constant 3 : index
    %99 = memref.load %arg2[%c3_71] : memref<4xf32, #tpu.memory_space<smem>>
    %100 = vector.broadcast %99 : f32 to vector<8x8xf32>
    %101 = arith.mulf %98, %100 : vector<8x8xf32>
    %c3_72 = arith.constant 3 : index
    %102 = memref.load %arg3[%c3_72] : memref<4xf32, #tpu.memory_space<smem>>
    %103 = vector.broadcast %102 : f32 to vector<8x8xf32>
    %104 = arith.addf %101, %103 : vector<8x8xf32>
    %cst_73 = arith.constant 0.000000e+00 : f32
    %cst_74 = arith.constant 6.000000e+00 : f32
    %105 = vector.broadcast %cst_73 : f32 to vector<8x8xf32>
    %106 = arith.maximumf %105, %104 : vector<8x8xf32>
    %107 = vector.broadcast %cst_74 : f32 to vector<8x8xf32>
    %108 = arith.minimumf %107, %106 : vector<8x8xf32>
    %c0_75 = arith.constant 0 : index
    %c3_76 = arith.constant 3 : index
    %c0_77 = arith.constant 0 : index
    %c0_78 = arith.constant 0 : index
    %109 = vector.load %arg8[%c0_75, %c3_76, %c0_77, %c0_78] : memref<1x4x8x8xf32, #tpu.memory_space<vmem>>, vector<1x1x8x8xf32>
    %110 = vector.shape_cast %109 : vector<1x1x8x8xf32> to vector<8x8xf32>
    %111 = vector.shape_cast %108 : vector<8x8xf32> to vector<1x1x8x8xf32>
    tpu.vector_store %arg8[%c0_75, %c3_76, %c0_77, %c0_78], %111 {strides = array<i32>} : memref<1x4x8x8xf32, #tpu.memory_space<vmem>>, vector<1x1x8x8xf32>,
    %c0_79 = arith.constant 0 : index
    %c3_80 = arith.constant 3 : index
    %c0_81 = arith.constant 0 : index
    %c0_82 = arith.constant 0 : index
    %112 = vector.load %arg7[%c0_79, %c3_80, %c0_81, %c0_82] : memref<1x4x8x8xbf16, #tpu.memory_space<vmem>>, vector<1x1x8x8xbf16>
    %113 = vector.shape_cast %112 : vector<1x1x8x8xbf16> to vector<8x8xbf16>
    %114 = arith.extf %113 : vector<8x8xbf16> to vector<8x8xf32>
    %c3_83 = arith.constant 3 : index
    %115 = memref.load %arg4[%c3_83] : memref<4xf32, #tpu.memory_space<smem>>
    %116 = vector.broadcast %115 : f32 to vector<8x8xf32>
    %117 = arith.mulf %114, %116 : vector<8x8xf32>
    %c3_84 = arith.constant 3 : index
    %118 = memref.load %arg5[%c3_84] : memref<4xf32, #tpu.memory_space<smem>>
    %119 = vector.broadcast %118 : f32 to vector<8x8xf32>
    %120 = arith.addf %117, %119 : vector<8x8xf32>
    %cst_85 = arith.constant 0.000000e+00 : f32
    %cst_86 = arith.constant 6.000000e+00 : f32
    %121 = vector.broadcast %cst_85 : f32 to vector<8x8xf32>
    %122 = arith.maximumf %121, %120 : vector<8x8xf32>
    %123 = vector.broadcast %cst_86 : f32 to vector<8x8xf32>
    %124 = arith.minimumf %123, %122 : vector<8x8xf32>
    %c0_87 = arith.constant 0 : index
    %c3_88 = arith.constant 3 : index
    %c0_89 = arith.constant 0 : index
    %c0_90 = arith.constant 0 : index
    %125 = vector.load %arg9[%c0_87, %c3_88, %c0_89, %c0_90] : memref<1x4x8x8xf32, #tpu.memory_space<vmem>>, vector<1x1x8x8xf32>
    %126 = vector.shape_cast %125 : vector<1x1x8x8xf32> to vector<8x8xf32>
    %127 = vector.shape_cast %124 : vector<8x8xf32> to vector<1x1x8x8xf32>
    tpu.vector_store %arg9[%c0_87, %c3_88, %c0_89, %c0_90], %127 {strides = array<i32>} : memref<1x4x8x8xf32, #tpu.memory_space<vmem>>, vector<1x1x8x8xf32>,
    return
  }
  func.func @transform_0(%arg0: i32, %arg1: i32) -> i32 {
    %c0_i32 = arith.constant 0 : i32
    %c0_i32_0 = arith.constant 0 : i32
    return %c0_i32 : i32
  }
  func.func @transform_1(%arg0: i32, %arg1: i32) -> i32 {
    %c0_i32 = arith.constant 0 : i32
    %c0_i32_0 = arith.constant 0 : i32
    return %c0_i32 : i32
  }
  func.func @transform_2(%arg0: i32, %arg1: i32) -> i32 {
    %c0_i32 = arith.constant 0 : i32
    %c0_i32_0 = arith.constant 0 : i32
    return %c0_i32 : i32
  }
  func.func @transform_3(%arg0: i32, %arg1: i32) -> i32 {
    %c0_i32 = arith.constant 0 : i32
    %c0_i32_0 = arith.constant 0 : i32
    return %c0_i32 : i32
  }
  func.func @transform_4(%arg0: i32, %arg1: i32) -> (i32, i32, i32, i32) {
    %c0_i32 = arith.constant 0 : i32
    %c0_i32_0 = arith.constant 0 : i32
    %c0_i32_1 = arith.constant 0 : i32
    return %arg0, %c0_i32, %arg1, %c0_i32_0 : i32, i32, i32, i32
  }
  func.func @transform_5(%arg0: i32, %arg1: i32) -> (i32, i32, i32, i32) {
    %c0_i32 = arith.constant 0 : i32
    %c0_i32_0 = arith.constant 0 : i32
    %c0_i32_1 = arith.constant 0 : i32
    return %arg0, %c0_i32, %arg1, %c0_i32_0 : i32, i32, i32, i32
  }
  func.func @transform_6(%arg0: i32, %arg1: i32) -> (i32, i32, i32, i32) {
    %c0_i32 = arith.constant 0 : i32
    %c0_i32_0 = arith.constant 0 : i32
    %c0_i32_1 = arith.constant 0 : i32
    return %arg0, %c0_i32, %arg1, %c0_i32_0 : i32, i32, i32, i32
  }
  func.func @transform_7(%arg0: i32, %arg1: i32) -> (i32, i32, i32, i32) {
    %c0_i32 = arith.constant 0 : i32
    %c0_i32_0 = arith.constant 0 : i32
    %c0_i32_1 = arith.constant 0 : i32
    return %arg0, %c0_i32, %arg1, %c0_i32_0 : i32, i32, i32, i32
  }
}

</mosaic_0001>

<bundles_post_ra>
// kernel: wt_forward.3
= control target key start
LH: loop header
LB: loop body
LE: loop exit
PB: predicated region body
PF: predicated region fallthrough
CT: control target
= control target key end

     0   :  { %s1318_s0 = inlined_call_operand.vmem [shape: f32[4], index: 0, kind: input, shape index: {}]   ;;  %s1319_s1 = inlined_call_operand.vmem [shape: f32[4], index: 1, kind: input, shape index: {}]   ;;  %s1320_s2 = inlined_call_operand.vmem [shape: f32[4], index: 2, kind: input, shape index: {}]   ;;  %s1321_s3 = inlined_call_operand.vmem [shape: f32[4], index: 3, kind: input, shape index: {}]   ;;  %s1322_s4 = inlined_call_operand.vmem [shape: bf16[2,4,8,8], index: 4, kind: input, shape index: {}]   ;;  %s1323_s5 = inlined_call_operand.vmem [shape: bf16[2,4,8,8], index: 5, kind: input, shape index: {}]   ;;  %s1324_s6 = inlined_call_operand.hbm [shape: f32[2,4,8,8], index: 6, kind: output, shape index: {0}]   ;;  %s1325_s7 = inlined_call_operand.hbm [shape: f32[2,4,8,8], index: 7, kind: output, shape index: {1}]  }
   0x1   :  { %1327 = sst [smem:[#allocation19_spill]] %s1318_s0 }
   0x2   :  { %1328 = sst [smem:[#allocation20_spill]] %s1319_s1 }
   0x3   :  { %13 = vsyncpa [#allocation4], 0 }
   0x4   :  { %14 = vsyncpa [#allocation6], 0 }
   0x5   :  { %15 = vsyncpa [#allocation9], 0 }
   0x6   :  { %16 = vsyncpa [#allocation3], 0 }
   0x7   :  { %18 = vsyncpa [#allocation3 + $0x1], 0 }
   0x8   :  { %19 = vsyncpa [#allocation12], 0 }
   0x9   :  { %21 = vsyncpa [#allocation12 + $0x1], 0  ;;  %s1099_s24 = smov 0   ;;  %s1101_s25 = smov 0  }
   0xa   :  { %s1103_s26 = smov 0   ;;  %s1105_s27 = smov 0  }
   0xb   :  { %s1107_s28 = smov 0   ;;  %s1109_s29 = smov 0  }
   0xc LB: > { %s711_s30 = sadd.s32 4294967295, %s1051_s29   ;;  %s712_s8 = sadd.s32 4294967294, %s1051_s29   ;;  %s1051_s29 = sphi %s1109_s29, %s27_s29   ;;  %s1047_s28 = sphi %s1107_s28, %s1341_s28   ;;  %s1043_s27 = sphi %s1105_s27, %s1340_s27   ;;  %s1039_s26 = sphi %s1103_s26, %s1339_s26   ;;  %s1035_s25 = sphi %s1101_s25, %s1338_s25   ;;  %s1031_s24 = sphi %s1099_s24, %s1337_s24  }
   0xd   : > { %s39_s9 = sadd.s32 1, %s1047_s28  ;;  %s188_s10 = sadd.s32 1, %s1039_s26 }
   0xe   : > { %p41_p0 = scmp.ge.s32.totalorder %s39_s9, 2  ;;  %p198_p1 = scmp.ne.s32.totalorder %s1039_s26, %s1035_s25 }
   0xf   : > { %p199_p2 = scmp.eq.s32.totalorder %s711_s30, 1  ;;  %p204_p3 = scmp.ne.s32.totalorder %s1035_s25, %s1031_s24 }
  0x10   : > { %s1343_s9 = smov (%p41_p0, %s39_s9), 0  ;;  %p205_p5 = scmp.eq.s32.totalorder %s712_s8, 1 }
  0x11   : > { %1329 = sst [smem:[#allocation18_spill]] %s1343_s9  ;;  %p1139_p4 = por %p199_p2, %p198_p1 }
  0x12   : > { %s183_s12 = ssub.s32 %s1047_s28, %s1343_s9  ;;  %p713_p6 = scmp.ge.s32.totalorder %s1051_s29, 1 }
  0x13   : > { %p186_p7 = scmp.eq.s32.totalorder %s183_s12, 0  ;;  %p1146_p8 = por %p205_p5, %p204_p3 }
  0x14   : > { %p240_p9 = scmp.lt.s32.totalorder %s1051_s29, 3  ;;  %p1158_p11 = scmp.eq.s32.totalorder %s711_s30, 0 }
  0x15   : > { %s1152_s14 = scalar_select %p186_p7, %s1039_s26, %s188_s10  }
  0x16   : > { %p1154_p10 = pnand %p713_p6, %p240_p9  ;;  %s1334_s1 = sld [smem:[#allocation20_spill]] }
  0x17   : > { %s1335_s0 = sld [smem:[#allocation19_spill]]  ;;  %s272_s8 = sshll.u32 %s1320_s2, 4  ;;  %s273_s8 = int_to_ptr.vmem [resolvable:$true] %s272_s8 }
  0x18   : > { %p786_p12 = pneg %p1154_p10  ;;  %s1053_s10 = smov [#allocation5]  }
  0x19   : > { %s1054_s12 = smov [#allocation2]   ;;  %s1055_s17 = smov [#allocation7]  }
  0x1a   : > { %p787_p13 = pnand %p1158_p11, %p786_p12  ;;  %s282_s9 = sshll.u32 %s1321_s3, 4  ;;  %s283_s9 = int_to_ptr.vmem [resolvable:$true] %s282_s9 }
  0x1b   : > { %s1056_s20 = smov [#allocation8]  }
  0x1c   : > { %s262_s19 = sshll.u32 %s1334_s1, 4  ;;  %s263_s19 = int_to_ptr.vmem [resolvable:$true] %s262_s19 }
  0x1d   : > { %s252_s22 = sshll.u32 %s1335_s0, 4  ;;  %317 = sbr.rel (%p1154_p10) target bundleno = 90 (0x5a), region = 44  ;;  %s253_s22 = int_to_ptr.vmem [resolvable:$true] %s252_s22 }
  0x1e   : > { %792 = dma.vmem_to_smem (!%p787_p13), %s263_s19, 16, %s1053_s10, [#allocation6]  }
  0x1f   : > { %789 = dma.vmem_to_smem (!%p787_p13), %s253_s22, 16, %s1054_s12, [#allocation4]  }
  0x20   : > { %795 = dma.vmem_to_smem (!%p787_p13), %s273_s8, 16, %s1055_s17, [#allocation6]  }
  0x21   : > { %798 = dma.vmem_to_smem (!%p787_p13), %s283_s9, 16, %s1056_s20, [#allocation9]  }
  0x22   : > { %1010 = dma.done.wait (%p1158_p11), [#allocation4], 16  }
  0x23   : > { %1012 = vsyncadd (%p1158_p11), [#allocation4], 4294967280 }
  0x24   : > { %1014 = dma.done.wait (%p1158_p11), [#allocation6], 32  }
  0x25   : > { %1016 = vsyncadd (%p1158_p11), [#allocation6], 4294967264 }
  0x26   : > { %1018 = dma.done.wait (%p1158_p11), [#allocation9], 16  }
  0x27   : > { %1020 = vsyncadd (%p1158_p11), [#allocation9], 4294967280 }
  0x28   : > { %339 = sfence }
  0x29   : > { %p382_p0 = scmp.lt.s32.totalorder %s1043_s27, 1  ;;  %s400_s1 = sld [smem:[#allocation2]]  ;;  %vm408_vm0 = vcmask 64512  }
  0x2a   : > { %s403_s9 = sld [smem:[#allocation5]]  ;;  %s1201_s12 = sand.u32 1, %s1035_s25  }
  0x2b   : > { %s383_s15 = scalar_select %p382_p0, %s1043_s27, 1 }
  0x2c   : > { %s412_s10 = sld [smem:[#allocation7]] }
  0x2d   : > { %s762_s19 = sshll.u32 %s383_s15, 4  ;;  %s415_s17 = sld [smem:[#allocation8]] }
  0x2e   : > { %s389_s23 = scalar_lea.vmem %s1322_s4, %s762_s19  ;;  %s397_s16 = scalar_lea.vmem %s1323_s5, %s762_s19 }
  0x2f   : > { %v398_v0 = vld [vmem:[%s389_s23] sm:$0xff]   ;;  %v401_v1 = vstv %s400_s1  ;;  %s731_s18 = sld [smem:[#allocation2 + $0x1]]  ;;  %s724_s15 = sshll.u32 %s1201_s12, 5  ;;  %v738_v11 = vld [vmem:[%s389_s23 + $0x8] sm:$0xff]  }
  0x30   : > { %v399_v2 = vunpack.c.l.bf16 %v398_v0  ;;  %v410_v3 = vld [vmem:[%s397_s16] sm:$0xff]   ;;  %v404_v4 = vstv %s403_s9  ;;  %s732_s20 = sld [smem:[#allocation5 + $0x1]]  ;;  %v423_v8 = vunpack.c.h.bf16 %v398_v0  ;;  %v742_v15 = vld [vmem:[%s397_s16 + $0x8] sm:$0xff]   ;;  %v449_v21 = vunpack.c.l.bf16 %v738_v11  ;;  %s1216_s30 = scalar_lea.vmem [#allocation10], %s724_s15 }
  0x31   : > { %v411_v6 = vunpack.c.l.bf16 %v410_v3  ;;  %s735_s21 = sld [smem:[#allocation7 + $0x1]]  ;;  %v436_v14 = vunpack.c.h.bf16 %v410_v3  ;;  %v462_v23 = vunpack.c.l.bf16 %v742_v15  ;;  %v475_v29 = vunpack.c.h.bf16 %v738_v11 }
  0x32   : > { %v402_v5 = vmul.f32 %v401_v1, %v399_v2  ;;  %s1204_s1 = sld [smem:[#allocation8 + $0x1]]  ;;  %v413_v10 = vstv %s412_s10  ;;  %v488_v36 = vunpack.c.h.bf16 %v742_v15 }
  0x33   : > { %s1206_s19 = sld [smem:[#allocation2 + $0x2]]  ;;  %v414_v12 = vmul.f32 %v413_v10, %v411_v6  ;;  %v416_v13 = vstv %s415_s17 }
  0x34   : > { %v405_v7 = vadd.f32 %v404_v4, %v402_v5  ;;  %s1208_s9 = sld [smem:[#allocation5 + $0x2]] }
  0x35   : > { %v425_v17 = vstv %s731_s18  ;;  %s1210_s22 = sld [smem:[#allocation7 + $0x2]]  ;;  %v417_v18 = vadd.f32 %v416_v13, %v414_v12  ;;  %s764_s18 = sshll.u32 %s1043_s27, 5 }
  0x36   : > { %v406_v9 = vmax.f32 %v405_v7, 0.0  ;;  %v426_v19 = vmul.f32 %v425_v17, %v423_v8  ;;  %v428_v20 = vstv %s732_s20  ;;  %s1212_s23 = sld [smem:[#allocation8 + $0x2]]  ;;  %s1235_s20 = scalar_lea.vmem [#allocation11], %s724_s15 }
  0x37   : > { %v438_v22 = vstv %s735_s21  ;;  %s1220_s8 = sld [smem:[#allocation2 + $0x3]]  ;;  %v418_v24 = vmax.f32 %v417_v18, 0.0  ;;  %s518_s15 = sshll.u32 %s1216_s30, 4  ;;  %s1255_s15 = int_to_ptr.vmem [resolvable:$true] %s518_s15 }
  0x38   : > { %v407_v16 = vmin.f32 %v406_v9, 6.0  ;;  %v429_v25 = vadd.f32 %v428_v20, %v426_v19  ;;  %v439_v26 = vmul.f32 %v438_v22, %v436_v14  ;;  %v441_v27 = vstv %s1204_s1  ;;  %s1223_s16 = sld [smem:[#allocation5 + $0x3]]  ;;  %s517_s1 = scalar_lea.hbm %s1324_s6, %s764_s18 }
  0x39   : > { %v451_v28 = vstv %s1206_s19  ;;  %s1226_s10 = sld [smem:[#allocation7 + $0x3]]  ;;  %v419_v30 = vmin.f32 %v418_v24, 6.0  ;;  %s520_s19 = sshll.u32 %s517_s1, 4  ;;  %s521_s19 = int_to_ptr.hbm [resolvable:$true] %s520_s19 }
  0x3a   : > { %409 = vst.msk [vmem:[%s1216_s30] sm:$0xff] %vm408_vm0, %v407_v16  ;;  %v430_v31 = vmax.f32 %v429_v25, 0.0  ;;  %v442_v32 = vadd.f32 %v441_v27, %v439_v26  ;;  %v452_v33 = vmul.f32 %v451_v28, %v449_v21  ;;  %s1228_s17 = sld [smem:[#allocation8 + $0x3]]  ;;  %v454_v34 = vstv %s1208_s9  ;;  %s949_s1 = scalar_lea.hbm %s1324_s6, 64 }
  0x3b   : > { %v464_v35 = vstv %s1210_s22  ;;  %420 = vst.msk [vmem:[%s1235_s20] sm:$0xff] %vm408_vm0, %v419_v30 }
  0x3c   : > { %v431_v37 = vmin.f32 %v430_v31, 6.0  ;;  %v443_v38 = vmax.f32 %v442_v32, 0.0  ;;  %v455_v39 = vadd.f32 %v454_v34, %v452_v33  ;;  %v465_v40 = vmul.f32 %v464_v35, %v462_v23 }
  0x3d   : > { %v467_v41 = vstv %s1212_s23  ;;  %v477_v42 = vstv %s1220_s8  ;;  %s535_s23 = scalar_lea.hbm %s1325_s7, %s764_s18  ;;  %s536_s8 = sshll.u32 %s1235_s20, 4  ;;  %s1262_s8 = int_to_ptr.vmem [resolvable:$true] %s536_s8 }
  0x3e   : > { %733 = vst.msk [vmem:[%s1216_s30 + $0x8] sm:$0xff] %vm408_vm0, %v431_v37  ;;  %v444_v43 = vmin.f32 %v443_v38, 6.0  ;;  %v456_v44 = vmax.f32 %v455_v39, 0.0  ;;  %v468_v45 = vadd.f32 %v467_v41, %v465_v40  ;;  %v478_v46 = vmul.f32 %v477_v42, %v475_v29 }
  0x3f   : > { %v480_v47 = vstv %s1223_s16  ;;  %v490_v48 = vstv %s1226_s10  ;;  %s538_s16 = sshll.u32 %s535_s23, 4  ;;  %s500_s10 = scalar_lea.sflag [#allocation3], %s1201_s12  ;;  %s1266_s16 = int_to_ptr.hbm [resolvable:$true] %s538_s16 }
  0x40   : > { %737 = vst.msk [vmem:[%s1235_s20 + $0x8] sm:$0xff] %vm408_vm0, %v444_v43  ;;  %v457_v49 = vmin.f32 %v456_v44, 6.0  ;;  %v469_v50 = vmax.f32 %v468_v45, 0.0  ;;  %v481_v51 = vadd.f32 %v480_v47, %v478_v46  ;;  %v491_v52 = vmul.f32 %v490_v48, %v488_v36 }
  0x41   : > { %v493_v53 = vstv %s1228_s17  ;;  %s943_s17 = sshra.s32 %s521_s19, 4  ;;  %s944_s17 = int_to_ptr.hbm [resolvable:$true] %s943_s17 }
  0x42   : > { %741 = vst.msk [vmem:[%s1216_s30 + $0x10] sm:$0xff] %vm408_vm0, %v457_v49  ;;  %v470_v54 = vmin.f32 %v469_v50, 6.0  ;;  %v482_v55 = vmax.f32 %v481_v51, 0.0  ;;  %v494_v56 = vadd.f32 %v493_v53, %v491_v52  ;;  %s945_s18 = scalar_lea.hbm %s944_s17, 32  ;;  %p950_p5 = scmp.lt.s32.totalorder %s944_s17, %s1324_s6 }
  0x43   : > { %p946_p1 = scmp.ne.s32.totalorder %s944_s17, %s945_s18  ;;  %p951_p6 = scmp.lt.s32.totalorder %s949_s1, %s945_s18 }
  0x44   : > { %745 = vst.msk [vmem:[%s1235_s20 + $0x10] sm:$0xff] %vm408_vm0, %v470_v54  ;;  %v483_v57 = vmin.f32 %v482_v55, 6.0  ;;  %v495_v58 = vmax.f32 %v494_v56, 0.0 }
  0x45   : > { %p947_p2 = pnand %p946_p1, %p1139_p4  ;;  %p952_p7 = por %p951_p6, %p950_p5 }
  0x46   : > { %749 = vst.msk [vmem:[%s1216_s30 + $0x18] sm:$0xff] %vm408_vm0, %v483_v57  ;;  %v496_v59 = vmin.f32 %v495_v58, 6.0 }
  0x47   : > { %p948_p3 = pneg %p947_p2 }
  0x49   : > { %p953_p9 = pnand %p952_p7, %p948_p3 }
  0x4b   : > { %956 = shalt.err (!%p953_p9)
}
  0x4c   : > { %s1057_s30 = smov 128   ;;  %s1058_s23 = smov 8   ;;  %753 = vst.msk [vmem:[%s1235_s20 + $0x18] sm:$0xff] %vm408_vm0, %v496_v59 }
  0x4d   : > { %782 = dma.vmem_to_hbm [thread:$0]  (%p1139_p4), %s1255_s15, 512, %s521_s19, %s500_s10, %s1057_s30, %s1057_s30, %s1058_s23  }
  0x4e   : > { %s505_s27 = scalar_lea.sflag [#allocation12], %s1201_s12  ;;  %s971_s21 = sshra.s32 %s1266_s16, 4  ;;  %s972_s21 = int_to_ptr.hbm [resolvable:$true] %s971_s21 }
  0x4f   : > { %s973_s17 = scalar_lea.hbm %s972_s21, 32  ;;  %s977_s9 = scalar_lea.hbm %s1325_s7, 64 }
  0x50   : > { %p974_p10 = scmp.ne.s32.totalorder %s972_s21, %s973_s17  ;;  %p978_p13 = scmp.lt.s32.totalorder %s972_s21, %s1325_s7 }
  0x51   : > { %p979_p0 = scmp.lt.s32.totalorder %s977_s9, %s973_s17 }
  0x52   : > { %p975_p11 = pnand %p974_p10, %p1139_p4 }
  0x53   : > { %p980_p1 = por %p979_p0, %p978_p13 }
  0x54   : > { %p976_p12 = pneg %p975_p11 }
  0x56   : > { %p981_p2 = pnand %p980_p1, %p976_p12 }
  0x58   : > { %984 = shalt.err (!%p981_p2)
}
  0x59   : > { %783 = dma.vmem_to_hbm [thread:$0]  (%p1139_p4), %s1262_s8, 512, %s1266_s16, %s505_s27, %s1057_s30, %s1057_s30, %s1058_s23  }
  0x5a PF: > { %p814_p3 = scmp.ge.s32.totalorder %s1051_s29, 2  ;;  %s553_s12 = sand.u32 1, %s1031_s24  }
  0x5b   : > { %s554_s0 = scalar_lea.sflag [#allocation3], %s553_s12 }
  0x5c   : > { %p800_p5 = pnand %p814_p3, %p1146_p8 }
  0x5e   : > { %p801_p6 = pneg %p800_p5 }
  0x60   : > { %1022 = dma.done.wait (%p801_p6), %s554_s0, 512  }
  0x61   : > { %1024 = vsyncadd (%p801_p6), %s554_s0, 4294966784  ;;  %s564_s20 = scalar_lea.sflag [#allocation12], %s553_s12 }
  0x62   : > { %1026 = dma.done.wait (%p801_p6), %s564_s20, 512  }
  0x63   : > { %1028 = vsyncadd (%p801_p6), %s564_s20, 4294966784  ;;  %s27_s29 = sadd.s32 1, %s1051_s29   ;;  %s1336_s11 = sld [smem:[#allocation18_spill]] }
  0x64   : > { %p24_p7 = scmp.ge.s32.totalorder %s27_s29, 4   ;;  %s1337_s24 = smov %s1035_s25 }
  0x65   : > { %s1338_s25 = smov %s1039_s26  ;;  %s1339_s26 = smov %s1152_s14 }
  0x66   : > { %s1340_s27 = smov %s1047_s28  ;;  %26 = sbr.rel (!%p24_p7) target bundleno = 12 (0xc), region = 128 }
  0x69   : > { %s1341_s28 = smov %s1336_s11 }
  0x6b   :  { %570 = vsyncpa [#allocation3], 1 }
  0x6c   :  { %572 = vsyncpa [#allocation3 + $0x1], 1 }
  0x6d   :  { %573 = vsyncpa [#allocation12], 1 }
  0x6e   :  { %575 = vsyncpa [#allocation12 + $0x1], 1 }
  0x6f   :  { %576 = vsyncpa [#allocation4], 1 }
  0x70   :  { %578 = vsyncpa [#allocation4 + $0x1], 1 }
  0x71   :  { %579 = vsyncpa [#allocation6], 1 }
  0x72   :  { %580 = vsyncpa [#allocation9], 1 }

// kernel: wt_forward.2
= control target key start
LH: loop header
LB: loop body
LE: loop exit
PB: predicated region body
PF: predicated region fallthrough
CT: control target
= control target key end

     0   :  { %s3400_s0 = inlined_call_operand.vmem [shape: f32[4,4], index: 0, kind: input, shape index: {}]   ;;  %s3401_s1 = inlined_call_operand.vmem [shape: f32[4], index: 1, kind: input, shape index: {}]   ;;  %s3402_s2 = inlined_call_operand.vmem [shape: f32[4,12], index: 2, kind: input, shape index: {}]   ;;  %s3403_s3 = inlined_call_operand.vmem [shape: f32[4], index: 3, kind: input, shape index: {}]   ;;  %s3404_s4 = inlined_call_operand.vmem [shape: f32[16,16], index: 4, kind: input, shape index: {}]   ;;  %s3405_s5 = inlined_call_operand.vmem [shape: f32[2,4,8,32], index: 5, kind: input, shape index: {}]   ;;  %s3406_s6 = inlined_call_operand.vmem [shape: bf16[2,4,8,8], index: 6, kind: output, shape index: {0}]   ;;  %s3407_s7 = inlined_call_operand.vmem [shape: bf16[2,4,8,8], index: 7, kind: output, shape index: {1}]   ;;  %s3408_s8 = inlined_call_operand.vmem [shape: f32[2,1,4,4], index: 8, kind: output, shape index: {2}]  }
   0x1   :  { %3409 = sst [smem:[#allocation12_spill]] %s3400_s0 }
   0x2   :  { %3410 = sst [smem:[#allocation13_spill]] %s3401_s1 }
   0x3   :  { %3411 = sst [smem:[#allocation14_spill]] %s3402_s2 }
   0x4   :  { %14 = vsyncpa [#allocation3], 0 }
   0x5   :  { %15 = vsyncpa [#allocation5], 0 }
   0x6   :  { %16 = vsyncpa [#allocation8], 0  ;;  %s2840_s27 = smov 0   ;;  %s2842_s28 = smov 0  }
   0x7   :  { %s2844_s29 = smov 0  }
   0x8 LB: > { %s3412_s1 = sld [smem:[#allocation13_spill]]  ;;  %s2530_s11 = sadd.s32 4294967295, %s2787_s29   ;;  %s2787_s29 = sphi %s2844_s29, %s22_s29   ;;  %s2783_s28 = sphi %s2842_s28, %s3419_s28   ;;  %s2779_s27 = sphi %s2840_s27, %s3418_s27  }
   0x9   : > { %p2532_p0 = scmp.ge.s32.totalorder %s2787_s29, 1  ;;  %p256_p1 = scmp.lt.s32.totalorder %s2787_s29, 3 }
   0xa   : > { %p2861_p2 = scmp.eq.s32.totalorder %s2530_s11, 0  ;;  %s34_s14 = sadd.s32 1, %s2783_s28 }
   0xb   : > { %p2865_p3 = pnand %p2532_p0, %p256_p1  ;;  %s3415_s0 = sld [smem:[#allocation12_spill]] }
   0xc   : > { %p36_p6 = scmp.ge.s32.totalorder %s34_s14, 2  ;;  %s3417_s2 = sld [smem:[#allocation14_spill]] }
   0xd   : > { %p2642_p4 = pneg %p2865_p3  ;;  %s2789_s22 = smov [#allocation4]  }
   0xe   : > { %s278_s10 = sshll.u32 %s3412_s1, 4  ;;  %s3421_s14 = smov (%p36_p6, %s34_s14), 0  ;;  %s279_s10 = int_to_ptr.vmem [resolvable:$true] %s278_s10 }
   0xf   : > { %p2877_p5 = pnand %p2861_p2, %p2642_p4  ;;  %s2790_s23 = smov [#allocation2]  }
  0x10   : > { %s2791_s24 = smov [#allocation6]   ;;  %s298_s30 = sshll.u32 %s3403_s3, 4  ;;  %s299_s30 = int_to_ptr.vmem [resolvable:$true] %s298_s30 }
  0x11   : > { %s268_s17 = sshll.u32 %s3415_s0, 4  ;;  %s2792_s9 = smov [#allocation7]   ;;  %s269_s17 = int_to_ptr.vmem [resolvable:$true] %s268_s17 }
  0x12   : > { %s288_s21 = sshll.u32 %s3417_s2, 4  ;;  %325 = sbr.rel (%p2865_p3) target bundleno = 821 (0x335), region = 44  ;;  %s289_s21 = int_to_ptr.vmem [resolvable:$true] %s288_s21 }
  0x13   : > { %2648 = dma.vmem_to_smem (!%p2877_p5), %s279_s10, 16, %s2789_s22, [#allocation5]  }
  0x14   : > { %2645 = dma.vmem_to_smem (!%p2877_p5), %s269_s17, 64, %s2790_s23, [#allocation3]  }
  0x15   : > { %2651 = dma.vmem_to_smem (!%p2877_p5), %s289_s21, 64, %s2791_s24, [#allocation5]  }
  0x16   : > { %2654 = dma.vmem_to_smem (!%p2877_p5), %s299_s30, 16, %s2792_s9, [#allocation8]  }
  0x17   : > { %2766 = dma.done.wait (%p2861_p2), [#allocation3], 64  }
  0x18   : > { %2768 = vsyncadd (%p2861_p2), [#allocation3], 4294967232 }
  0x19   : > { %2770 = dma.done.wait (%p2861_p2), [#allocation5], 80  }
  0x1a   : > { %2772 = vsyncadd (%p2861_p2), [#allocation5], 4294967216 }
  0x1b   : > { %2774 = dma.done.wait (%p2861_p2), [#allocation8], 16  }
  0x1c   : > { %2776 = vsyncadd (%p2861_p2), [#allocation8], 4294967280 }
  0x1d   : > { %347 = sfence }
  0x1e   : > { %p397_p7 = scmp.lt.s32.totalorder %s2779_s27, 1  ;;  %s2793_s16 = smov 112   ;;  %v429_v4 = vld [vmem:[%s3404_s4 + $0x8] sm:$0xff]  ;;  %v428_v6 = vld [vmem:[%s3404_s4] sm:$0xff]  ;;  %vm437_vm0 = vcmask 130048   ;;  %vm2162_vm1 = vcmask 60416  }
  0x1f   : > { %v2931_v5 = vand.u32 4294901760, %v429_v4  ;;  %v2939_v8 = vand.u32 4294901760, %v428_v6  ;;  %s2562_s20 = sld [smem:[#allocation6 + $0x181]]  ;;  %s2794_s26 = smov 120   ;;  %vm2175_vm2 = vcmask 64512   ;;  %vm2198_vm3 = vcmask 1041409  }
  0x20   : > { %s3423_s27 = smov (!%p397_p7, %s2779_s27), 1  ;;  %s2554_s21 = sld [smem:[#allocation6 + $0x81]]  ;;  %vm2200_vm4 = vcmask 1042434   ;;  %vm2202_vm5 = vcmask 1043459   ;;  %vm2309_vm6 = vcmask 1040384   ;;  %vm2311_vm7 = vcmask 1041408  }
  0x21   : > { %s2623_s10 = sshll.u32 %s3423_s27, 5  ;;  %v2937_v7 = vsub.f32 %v429_v4, %v2931_v5  ;;  %540 = vmatpush.msra.mxu3 %v2931_v5  ;;  %456 = vmatpush.msra.mxu0 %v2931_v5  ;;  %v2947_v10 = vsub.f32 %v428_v6, %v2939_v8  ;;  %s2550_s22 = sld [smem:[#allocation6 + $0x1]]  ;;  %vm2313_vm8 = vcmask 1042432   ;;  %vm2315_vm9 = vcmask 27648  }
  0x22   : > { %s404_s15 = scalar_lea.vmem %s3405_s5, %s2623_s10  ;;  %s2558_s23 = sld [smem:[#allocation6 + $0x101]] }
  0x23   : > { %v430_v0 = vld [vmem:[%s404_s15] sm:$0xff]  ;;  %v2919_v1 = vld [vmem:[%s404_s15 + $0x10] sm:$0xff]  ;;  %v2922_v2 = vld [vmem:[%s404_s15 + $0x8] sm:$0xff]  ;;  %v2944_v9 = vand.u32 4294901760, %v2937_v7  ;;  %515 = vmatpush.msra.mxu2 %v2937_v7  ;;  %542 = vmatpush.msra.mxu3 %v2939_v8  ;;  %v2955_v12 = vand.u32 4294901760, %v2947_v10  ;;  %s2559_s24 = sld [smem:[#allocation6 + $0x102]] }
  0x24   : > { %432 = vrot.lane.b32.xlu0 %v430_v0, %s2793_s16  ;;  %1281 = vrot.lane.b32.xlu1 %v2919_v1, %s2793_s16  ;;  %v2924_v3 = vld [vmem:[%s404_s15 + $0x18] sm:$0xff]  ;;  %s2555_s25 = sld [smem:[#allocation6 + $0x82]] }
  0x25   : > { %458 = vmatpush.msra.mxu0 %v2939_v8  ;;  %v485_v11 = vsub.f32 %v2937_v7, %v2944_v9  ;;  %518 = vmatpush.msra.mxu2 %v2947_v10  ;;  %v491_v14 = vsub.f32 %v2947_v10, %v2955_v12  ;;  %s2551_s30 = sld [smem:[#allocation6 + $0x2]] }
  0x26   : > { %s2571_s9 = sld [smem:[#allocation6 + $0x84]] }
  0x27   : > { %567 = vmatpush.msrb.mxu0 %v2944_v9  ;;  %618 = vmatpush.msrb.mxu2 %v2931_v5  ;;  %v2960_v13 = vand.u32 4294901760, %v485_v11  ;;  %v2967_v15 = vand.u32 4294901760, %v491_v14  ;;  %s2567_s10 = sld [smem:[#allocation6 + $0x4]] }
  0x28   : > { %s2563_s11 = sld [smem:[#allocation6 + $0x182]] }
  0x29   : > { %571 = vmatpush.msrb.mxu0 %v2955_v12  ;;  %620 = vmatpush.msrb.mxu2 %v2939_v8  ;;  %s2575_s13 = sld [smem:[#allocation6 + $0x104]] }
  0x2a   : > { %487 = vmatpush.msra.mxu1 %v2960_v13  ;;  %649 = vmatpush.msrb.mxu3 %v2960_v13  ;;  %s2572_s15 = sld [smem:[#allocation6 + $0x85]] }
  0x2b   : > { %s2579_s12 = sld [smem:[#allocation6 + $0x184]] }
  0x2c   : > { %853 = vrot.lane.b32.xlu0 %v2922_v2, %s2793_s16  ;;  %1709 = vrot.lane.b32.xlu1 %v2924_v3, %s2793_s16  ;;  %s2568_s16 = sld [smem:[#allocation6 + $0x5]] }
  0x2d   : > { %493 = vmatpush.msra.mxu1 %v2967_v15  ;;  %655 = vmatpush.msrb.mxu3 %v2967_v15  ;;  %s2580_s17 = sld [smem:[#allocation6 + $0x185]] }
  0x2e   : > { %s3100_s18 = sld [smem:[#allocation2 + $0x80]] }
  0x2f   : > { %592 = vmatpush.msrb.mxu1 %v2931_v5  ;;  %s2584_s19 = sld [smem:[#allocation6 + $0x7]] }
  0x30   : > { %s3150_s0 = sld [smem:[#allocation6 + $0x188]] }
  0x31   : > { %594 = vmatpush.msrb.mxu1 %v2939_v8  ;;  %s3159_s1 = sld [smem:[#allocation2 + $0x83]] }
  0x32   : > { %s3163_s2 = sld [smem:[#allocation4 + $0x1]] }
  0x96   : > { %v433_v16 = vpop.permute.xlu0 %432  ;;  %v1282_v44 = vpop.permute.xlu1 %1281 }
  0x97   : > { %v435_v17 = vadd.f32 %v433_v16, %v430_v0  ;;  %v436_v18 = vsub.f32 %v430_v0, %v433_v16  ;;  %v1284_v46 = vadd.f32 %v2919_v1, %v1282_v44  ;;  %v1285_v48 = vsub.f32 %v2919_v1, %v1282_v44 }
  0x99   : > { %v439_v19 = vsel %vm437_vm0, %v435_v17, 0  ;;  %v601_v20 = vsel %vm437_vm0, %v436_v18, 0  ;;  %v1287_v49 = vsel %vm437_vm0, %v1284_v46, 0  ;;  %v1449_v50 = vsel %vm437_vm0, %v1285_v48, 0 }
  0x9a   : > { %v459_v21 = vand.u32 4294901760, %v439_v19  ;;  %v621_v22 = vand.u32 4294901760, %v601_v20  ;;  %v1307_v51 = vand.u32 4294901760, %v1287_v49  ;;  %v1469_v52 = vand.u32 4294901760, %v1449_v50 }
  0x9c   : > { %v622_v23 = vsub.f32 %v601_v20, %v621_v22  ;;  %495 = vmatmul.f32.vlgmr.msra.gmra.mxu1 %v459_v21  ;;  %v460_v24 = vsub.f32 %v439_v19, %v459_v21  ;;  %v1308_v53 = vsub.f32 %v1287_v49, %v1307_v51  ;;  %v1470_v54 = vsub.f32 %v1449_v50, %v1469_v52 }
  0x9d   : > { %702 = vmatpush.msra.mxu1 %v2931_v5 }
  0x9e   : > { %521 = vmatmul.f32.vlgmr.msra.gmra.mxu2 %v460_v24  ;;  %v461_v25 = vand.u32 4294901760, %v460_v24  ;;  %v623_v26 = vand.u32 4294901760, %v622_v23  ;;  %v854_v29 = vpop.permute.xlu0 %853  ;;  %v1309_v55 = vand.u32 4294901760, %v1308_v53  ;;  %v1471_v56 = vand.u32 4294901760, %v1470_v54  ;;  %v1710_v59 = vpop.permute.xlu1 %1709 }
  0x9f   : > { %729 = vmatpush.msra.mxu2 %v2944_v9  ;;  %704 = vmatpush.msra.mxu1 %v2939_v8  ;;  %v856_v31 = vadd.f32 %v2922_v2, %v854_v29  ;;  %v857_v33 = vsub.f32 %v2922_v2, %v854_v29  ;;  %v1712_v61 = vadd.f32 %v2924_v3, %v1710_v59 }
  0xa0   : > { %546 = vmatmul.f32.vlgmr.msra.gmra.mxu3 %v461_v25  ;;  %v462_v27 = vsub.f32 %v460_v24, %v461_v25  ;;  %v624_v28 = vsub.f32 %v622_v23, %v623_v26  ;;  %v1310_v57 = vsub.f32 %v1308_v53, %v1309_v55  ;;  %v1472_v58 = vsub.f32 %v1470_v54, %v1471_v56 }
  0xa1   : > { %754 = vmatpush.msra.mxu3 %v2931_v5  ;;  %733 = vmatpush.msra.mxu2 %v2955_v12  ;;  %v859_v34 = vsel %vm437_vm0, %v856_v31, 0  ;;  %v1021_v35 = vsel %vm437_vm0, %v857_v33, 0  ;;  %v1713_v63 = vsub.f32 %v2924_v3, %v1710_v59  ;;  %v1715_v0 = vsel %vm437_vm0, %v1712_v61, 0 }
  0xa2   : > { %v463_v30 = vand.u32 4294901760, %v462_v27  ;;  %v625_v32 = vand.u32 4294901760, %v624_v28  ;;  %v879_v36 = vand.u32 4294901760, %v859_v34  ;;  %v1041_v37 = vand.u32 4294901760, %v1021_v35 }
  0xa3   : > { %756 = vmatpush.msra.mxu3 %v2939_v8  ;;  %v1311_v60 = vand.u32 4294901760, %v1310_v57  ;;  %v1473_v62 = vand.u32 4294901760, %v1472_v58  ;;  %v1877_v1 = vsel %vm437_vm0, %v1713_v63, 0  ;;  %v1735_v2 = vand.u32 4294901760, %v1715_v0 }
  0xa4   : > { %464 = vmatmul.f32.vlgmr.msra.gmra.mxu0 %v463_v30  ;;  %596 = vmatmul.f32.vlgmr.msrb.gmra.mxu1 %v459_v21  ;;  %v880_v38 = vsub.f32 %v859_v34, %v879_v36  ;;  %v1042_v39 = vsub.f32 %v1021_v35, %v1041_v37  ;;  %v1897_v3 = vand.u32 4294901760, %v1877_v1  ;;  %v835_v25 = vstv %s2562_s20  ;;  %s2576_s20 = sld [smem:[#allocation6 + $0x105]] }
  0xa5   : > { %677 = vmatpush.msra.mxu0 %v2937_v7  ;;  %907 = vmatpush.msrb.mxu1 %v2960_v13  ;;  %v1736_v4 = vsub.f32 %v1715_v0, %v1735_v2  ;;  %v769_v27 = vstv %s2550_s22  ;;  %v1213_v61 = vstv %s2571_s9  ;;  %v843_v0 = vstv %s2563_s11  ;;  %s3106_s22 = sld [smem:[#allocation2 + $0x100]] }
  0xa6   : > { %626 = vmatmul.f32.vlgmr.msrb.gmra.mxu2 %v625_v32  ;;  %v881_v40 = vand.u32 4294901760, %v880_v38  ;;  %v1043_v41 = vand.u32 4294901760, %v1042_v39  ;;  %v1898_v6 = vsub.f32 %v1877_v1, %v1897_v3  ;;  %s2592_s9 = sld [smem:[#allocation6 + $0x107]] }
  0xa7   : > { %680 = vmatpush.msra.mxu0 %v2947_v10  ;;  %935 = vmatpush.msrb.mxu2 %v2937_v7  ;;  %v1737_v11 = vand.u32 4294901760, %v1736_v4  ;;  %s3124_s11 = sld [smem:[#allocation2 + $0x181]] }
  0xa8   : > { %657 = vmatmul.f32.vlgmr.msrb.gmra.mxu3 %v621_v22  ;;  %913 = vmatpush.msrb.mxu1 %v2967_v15  ;;  %v882_v42 = vsub.f32 %v880_v38, %v881_v40  ;;  %v1044_v43 = vsub.f32 %v1042_v39, %v1043_v41  ;;  %v1899_v14 = vand.u32 4294901760, %v1898_v6 }
  0xa9   : > { %960 = vmatpush.msrb.mxu3 %v2931_v5  ;;  %938 = vmatpush.msrb.mxu2 %v2947_v10  ;;  %v1738_v16 = vsub.f32 %v1736_v4, %v1737_v11 }
  0xaa   : > { %v883_v45 = vand.u32 4294901760, %v882_v42  ;;  %v1045_v47 = vand.u32 4294901760, %v1044_v43  ;;  %v821_v42 = vstv %s2559_s24  ;;  %v799_v43 = vstv %s2555_s25  ;;  %s3111_s24 = sld [smem:[#allocation2 + $0x180]] }
  0xab   : > { %962 = vmatpush.msrb.mxu3 %v2939_v8  ;;  %s3114_s25 = sld [smem:[#allocation2 + $0x81]] }
  0xac   : > { %573 = vmatmul.f32.vlgmr.msrb.gmra.mxu0 %v459_v21  ;;  %708 = vmatmul.f32.vlgmr.msra.gmra.mxu1 %v623_v26  ;;  %v791_v26 = vstv %s2554_s21  ;;  %s3104_s21 = sld [smem:[#allocation2]] }
  0xad   : > { %876 = vmatpush.msrb.mxu0 %v2931_v5  ;;  %1012 = vmatpush.msra.mxu1 %v2931_v5 }
  0xae   : > { %735 = vmatmul.f32.vlgmr.msra.gmra.mxu2 %v621_v22 }
  0xaf   : > { %878 = vmatpush.msrb.mxu0 %v2939_v8  ;;  %1038 = vmatpush.msra.mxu2 %v2931_v5 }
  0xb0   : > { %758 = vmatmul.f32.vlgmr.msra.gmra.mxu3 %v621_v22  ;;  %1014 = vmatpush.msra.mxu1 %v2939_v8 }
  0xb1   : > { %1069 = vmatpush.msra.mxu3 %v2960_v13  ;;  %1040 = vmatpush.msra.mxu2 %v2939_v8 }
  0xb3   : > { %1075 = vmatpush.msra.mxu3 %v2967_v15 }
  0xb4   : > { %683 = vmatmul.f32.vlgmr.msra.gmra.mxu0 %v622_v23  ;;  %915 = vmatmul.f32.vlgmr.msrb.gmra.mxu1 %v879_v36 }
  0xb5   : > { %987 = vmatpush.msra.mxu0 %v2944_v9  ;;  %1122 = vmatpush.msrb.mxu1 %v2931_v5 }
  0xb6   : > { %941 = vmatmul.f32.vlgmr.msrb.gmra.mxu2 %v880_v38 }
  0xb7   : > { %991 = vmatpush.msra.mxu0 %v2955_v12  ;;  %1149 = vmatpush.msrb.mxu2 %v2944_v9 }
  0xb8   : > { %966 = vmatmul.f32.vlgmr.msrb.gmra.mxu3 %v881_v40  ;;  %1124 = vmatpush.msrb.mxu1 %v2939_v8 }
  0xb9   : > { %1174 = vmatpush.msrb.mxu3 %v2931_v5  ;;  %1153 = vmatpush.msrb.mxu2 %v2955_v12 }
  0xbb   : > { %1176 = vmatpush.msrb.mxu3 %v2939_v8 }
  0xbc   : > { %884 = vmatmul.f32.vlgmr.msrb.gmra.mxu0 %v883_v45  ;;  %1016 = vmatmul.f32.vlgmr.msra.gmra.mxu1 %v879_v36 }
  0xbd   : > { %1097 = vmatpush.msrb.mxu0 %v2937_v7  ;;  %1335 = vmatpush.msra.mxu1 %v2960_v13 }
  0xbe   : > { %1046 = vmatmul.f32.vlgmr.msra.gmra.mxu2 %v1045_v47 }
  0xbf   : > { %1100 = vmatpush.msrb.mxu0 %v2947_v10  ;;  %1363 = vmatpush.msra.mxu2 %v2937_v7 }
  0xc0   : > { %1077 = vmatmul.f32.vlgmr.msra.gmra.mxu3 %v1041_v37  ;;  %1341 = vmatpush.msra.mxu1 %v2967_v15 }
  0xc1   : > { %1388 = vmatpush.msra.mxu3 %v2931_v5  ;;  %1366 = vmatpush.msra.mxu2 %v2947_v10 }
  0xc3   : > { %1390 = vmatpush.msra.mxu3 %v2939_v8 }
  0xc4   : > { %993 = vmatmul.f32.vlgmr.msra.gmra.mxu0 %v879_v36  ;;  %1128 = vmatmul.f32.vlgmr.msrb.gmra.mxu1 %v1043_v41 }
  0xc5   : > { %1304 = vmatpush.msra.mxu0 %v2931_v5  ;;  %1440 = vmatpush.msrb.mxu1 %v2931_v5 }
  0xc6   : > { %1155 = vmatmul.f32.vlgmr.msrb.gmra.mxu2 %v1041_v37 }
  0xc7   : > { %1306 = vmatpush.msra.mxu0 %v2939_v8  ;;  %1466 = vmatpush.msrb.mxu2 %v2931_v5 }
  0xc8   : > { %1178 = vmatmul.f32.vlgmr.msrb.gmra.mxu3 %v1041_v37  ;;  %1442 = vmatpush.msrb.mxu1 %v2939_v8 }
  0xc9   : > { %1497 = vmatpush.msrb.mxu3 %v2960_v13  ;;  %1468 = vmatpush.msrb.mxu2 %v2939_v8 }
  0xcb   : > { %1503 = vmatpush.msrb.mxu3 %v2967_v15 }
  0xcc   : > { %1103 = vmatmul.f32.vlgmr.msrb.gmra.mxu0 %v1042_v39  ;;  %1343 = vmatmul.f32.vlgmr.msra.gmra.mxu1 %v1307_v51  ;;  %v813_v39 = vstv %s2558_s23  ;;  %s3109_s23 = sld [smem:[#allocation6 + $0x87]] }
  0xcd   : > { %1415 = vmatpush.msrb.mxu0 %v2944_v9  ;;  %1550 = vmatpush.msra.mxu1 %v2931_v5 }
  0xce   : > { %1369 = vmatmul.f32.vlgmr.msra.gmra.mxu2 %v1308_v53  ;;  %v777_v53 = vstv %s2551_s30  ;;  %s3117_s30 = sld [smem:[#allocation2 + $0x1]] }
  0xcf   : > { %1419 = vmatpush.msrb.mxu0 %v2955_v12  ;;  %1577 = vmatpush.msra.mxu2 %v2944_v9 }
  0xd0   : > { %1394 = vmatmul.f32.vlgmr.msra.gmra.mxu3 %v1309_v55  ;;  %1552 = vmatpush.msra.mxu1 %v2939_v8 }
  0xd1   : > { %1602 = vmatpush.msra.mxu3 %v2931_v5  ;;  %1581 = vmatpush.msra.mxu2 %v2955_v12 }
  0xd3   : > { %1604 = vmatpush.msra.mxu3 %v2939_v8 }
  0xd4   : > { %1312 = vmatmul.f32.vlgmr.msra.gmra.mxu0 %v1311_v60  ;;  %1444 = vmatmul.f32.vlgmr.msrb.gmra.mxu1 %v1307_v51 }
  0xd5   : > { %1525 = vmatpush.msra.mxu0 %v2937_v7  ;;  %1763 = vmatpush.msrb.mxu1 %v2960_v13 }
  0xd6   : > { %1474 = vmatmul.f32.vlgmr.msrb.gmra.mxu2 %v1473_v62  ;;  %v1189_v62 = vstv %s2567_s10  ;;  %s3122_s10 = sld [smem:[#allocation2 + $0x101]] }
  0xd7   : > { %1528 = vmatpush.msra.mxu0 %v2947_v10  ;;  %1791 = vmatpush.msrb.mxu2 %v2937_v7 }
  0xd8   : > { %1505 = vmatmul.f32.vlgmr.msrb.gmra.mxu3 %v1469_v52  ;;  %1769 = vmatpush.msrb.mxu1 %v2967_v15 }
  0xd9   : > { %1816 = vmatpush.msrb.mxu3 %v2931_v5  ;;  %1794 = vmatpush.msrb.mxu2 %v2947_v10 }
  0xdb   : > { %1818 = vmatpush.msrb.mxu3 %v2939_v8 }
  0xdc   : > { %1421 = vmatmul.f32.vlgmr.msrb.gmra.mxu0 %v1307_v51  ;;  %1556 = vmatmul.f32.vlgmr.msra.gmra.mxu1 %v1471_v56 }
  0xdd   : > { %1732 = vmatpush.msrb.mxu0 %v2931_v5  ;;  %1868 = vmatpush.msra.mxu1 %v2931_v5 }
  0xde   : > { %1583 = vmatmul.f32.vlgmr.msra.gmra.mxu2 %v1469_v52 }
  0xdf   : > { %1734 = vmatpush.msrb.mxu0 %v2939_v8  ;;  %1870 = vmatpush.msra.mxu1 %v2939_v8 }
  0xe0   : > { %1606 = vmatmul.f32.vlgmr.msra.gmra.mxu3 %v1469_v52  ;;  %1894 = vmatpush.msra.mxu2 %v2931_v5 }
  0xe1   : > { %1925 = vmatpush.msra.mxu3 %v2960_v13  ;;  %v1900_v13 = vsub.f32 %v1898_v6, %v1899_v14 }
  0xe2   : > { %1896 = vmatpush.msra.mxu2 %v2939_v8 }
  0xe3   : > { %1931 = vmatpush.msra.mxu3 %v2967_v15  ;;  %v1739_v15 = vand.u32 4294901760, %v1738_v16  ;;  %v1901_v17 = vand.u32 4294901760, %v1900_v13 }
  0xe4   : > { %1531 = vmatmul.f32.vlgmr.msra.gmra.mxu0 %v1470_v54  ;;  %1771 = vmatmul.f32.vlgmr.msrb.gmra.mxu1 %v1735_v2 }
  0xe5   : > { %1843 = vmatpush.msra.mxu0 %v2944_v9  ;;  %1978 = vmatpush.msrb.mxu1 %v2931_v5 }
  0xe6   : > { %1797 = vmatmul.f32.vlgmr.msrb.gmra.mxu2 %v1736_v4 }
  0xe7   : > { %1847 = vmatpush.msra.mxu0 %v2955_v12  ;;  %1980 = vmatpush.msrb.mxu1 %v2939_v8 }
  0xe8   : > { %1822 = vmatmul.f32.vlgmr.msrb.gmra.mxu3 %v1737_v11  ;;  %2005 = vmatpush.msrb.mxu2 %v2944_v9 }
  0xe9   : > { %2030 = vmatpush.msrb.mxu3 %v2931_v5 }
  0xea   : > { %2009 = vmatpush.msrb.mxu2 %v2955_v12 }
  0xeb   : > { %2032 = vmatpush.msrb.mxu3 %v2939_v8 }
  0xec   : > { %1740 = vmatmul.f32.vlgmr.msrb.gmra.mxu0 %v1739_v15  ;;  %1872 = vmatmul.f32.vlgmr.msra.gmra.mxu1 %v1735_v2 }
  0xed   : > { %1953 = vmatpush.msrb.mxu0 %v2937_v7 }
  0xee   : > { %1902 = vmatmul.f32.vlgmr.msra.gmra.mxu2 %v1901_v17  ;;  %v1237_v17 = vstv %s2575_s13  ;;  %s3127_s13 = sld [smem:[#allocation6 + $0x187]] }
  0xef   : > { %1956 = vmatpush.msrb.mxu0 %v2947_v10 }
  0xf0   : > { %1933 = vmatmul.f32.vlgmr.msra.gmra.mxu3 %v1897_v3 }
  0xf4   : > { %1849 = vmatmul.f32.vlgmr.msra.gmra.mxu0 %v1735_v2  ;;  %1984 = vmatmul.f32.vlgmr.msrb.gmra.mxu1 %v1899_v14 }
  0xf6   : > { %2011 = vmatmul.f32.vlgmr.msrb.gmra.mxu2 %v1897_v3 }
  0xf8   : > { %2034 = vmatmul.f32.vlgmr.msrb.gmra.mxu3 %v1897_v3 }
  0xfc   : > { %1959 = vmatmul.f32.vlgmr.msrb.gmra.mxu0 %v1898_v6 }
 0x119   : > { %v496_v5 = vpop.f32.mrf.mxu1 }
 0x121   : > { %v465_v9 = vpop.f32.mrf.mxu0  ;;  %v522_v18 = vpop.f32.mrf.mxu2 }
 0x122   : > { %v497_v12 = vadd.f32 %v496_v5, %v465_v9  ;;  %v597_v8 = vpop.f32.mrf.mxu1 }
 0x123   : > { %v547_v19 = vpop.f32.mrf.mxu3 }
 0x124   : > { %v523_v20 = vadd.f32 %v522_v18, %v497_v12  ;;  %v1221_v18 = vstv %s2572_s15  ;;  %v1197_v12 = vstv %s2568_s16  ;;  %s3131_s15 = sld [smem:[#allocation6 + $0x8]] }
 0x125   : > { %s3134_s16 = sld [smem:[#allocation2 + $0x82]] }
 0x126   : > { %v548_v7 = vadd.f32 %v547_v19, %v523_v20 }
 0x129   : > { %v574_v21 = vpop.f32.mrf.mxu0  ;;  %v627_v22 = vpop.f32.mrf.mxu2 }
 0x12a   : > { %v575_v10 = vadd.f32 %v574_v21, %v548_v7  ;;  %v709_v23 = vpop.f32.mrf.mxu1 }
 0x12b   : > { %v658_v24 = vpop.f32.mrf.mxu3 }
 0x12c   : > { %v3068_v28 = vadd.f32 %v597_v8, %v575_v10  ;;  %v659_v32 = vadd.f32 %v658_v24, %v627_v22  ;;  %v1261_v24 = vstv %s2579_s12  ;;  %s3137_s12 = sld [smem:[#allocation2 + $0x2]] }
 0x12e   : > { %v836_v29 = vmul.f32 %v835_v25, %v3068_v28  ;;  %v792_v30 = vmul.f32 %v791_v26, %v3068_v28  ;;  %v770_v31 = vmul.f32 %v769_v27, %v3068_v28  ;;  %v814_v41 = vmul.f32 %v813_v39, %v3068_v28 }
 0x12f   : > { %v1269_v27 = vstv %s2580_s17  ;;  %s3140_s17 = sld [smem:[#allocation2 + $0x102]] }
 0x130   : > { %838 = vrot.lane.b32.xlu1 %v836_v29, %s2794_s26  ;;  %794 = vrot.lane.b32.xlu0 %v792_v30, %s2794_s26 }
 0x131   : > { %772 = vrot.lane.b32.xlu2 %v770_v31, %s2794_s26  ;;  %v684_v33 = vpop.f32.mrf.mxu0  ;;  %v736_v34 = vpop.f32.mrf.mxu2 }
 0x132   : > { %v685_v35 = vadd.f32 %v684_v33, %v659_v32  ;;  %v916_v36 = vpop.f32.mrf.mxu1 }
 0x133   : > { %v759_v37 = vpop.f32.mrf.mxu3 }
 0x134   : > { %v710_v38 = vadd.f32 %v709_v23, %v685_v35  ;;  %v1617_v35 = vstv %s2584_s19  ;;  %s3142_s19 = sld [smem:[#allocation6 + $0x88]] }
 0x136   : > { %v737_v40 = vadd.f32 %v736_v34, %v710_v38 }
 0x138   : > { %v3077_v44 = vadd.f32 %v759_v37, %v737_v40  ;;  %v1245_v37 = vstv %s2576_s20  ;;  %s3145_s20 = sld [smem:[#allocation2 + $0x182]] }
 0x139   : > { %816 = vrot.lane.b32.xlu2 %v814_v41, %s2794_s26  ;;  %v885_v45 = vpop.f32.mrf.mxu0  ;;  %v942_v46 = vpop.f32.mrf.mxu2  ;;  %v1641_v41 = vstv %s3109_s23  ;;  %s3147_s23 = sld [smem:[#allocation6 + $0x108]] }
 0x13a   : > { %v917_v47 = vadd.f32 %v916_v36, %v885_v45  ;;  %v1017_v48 = vpop.f32.mrf.mxu1  ;;  %v822_v49 = vmul.f32 %v821_v42, %v3077_v44  ;;  %v800_v50 = vmul.f32 %v799_v43, %v3077_v44  ;;  %v778_v54 = vmul.f32 %v777_v53, %v3077_v44 }
 0x13b   : > { %v967_v51 = vpop.f32.mrf.mxu3  ;;  %v844_v3 = vmul.f32 %v843_v0, %v3077_v44  ;;  %v1625_v53 = vstv %s3131_s15 }
 0x13c   : > { %v943_v52 = vadd.f32 %v942_v46, %v917_v47  ;;  %824 = vrot.lane.b32.xlu0 %v822_v49, %s2794_s26  ;;  %802 = vrot.lane.b32.xlu1 %v800_v50, %s2794_s26 }
 0x13e   : > { %v968_v55 = vadd.f32 %v967_v51, %v943_v52 }
 0x141   : > { %780 = vrot.lane.b32.xlu2 %v778_v54, %s2794_s26  ;;  %v994_v56 = vpop.f32.mrf.mxu0  ;;  %v1047_v57 = vpop.f32.mrf.mxu2  ;;  %v1689_v54 = vstv %s3127_s13  ;;  %s3169_s13 = sld [smem:[#allocation2 + $0x3]] }
 0x142   : > { %v995_v58 = vadd.f32 %v994_v56, %v968_v55  ;;  %v1129_v59 = vpop.f32.mrf.mxu1 }
 0x143   : > { %v1078_v60 = vpop.f32.mrf.mxu3 }
 0x144   : > { %v3086_v63 = vadd.f32 %v1017_v48, %v995_v58  ;;  %v1079_v4 = vadd.f32 %v1078_v60, %v1047_v57  ;;  %v1665_v48 = vstv %s2592_s9  ;;  %s3154_s9 = sld [smem:[#allocation6 + $0xa]]  ;;  %v785_v58 = vstv %s3100_s18 }
 0x145   : > { %v763_v60 = vstv %s3104_s21  ;;  %s3174_s18 = sld [smem:[#allocation2 + $0x103]] }
 0x146   : > { %v1214_v1 = vmul.f32 %v1213_v61, %v3086_v63  ;;  %v1190_v2 = vmul.f32 %v1189_v62, %v3086_v63  ;;  %v1238_v9 = vmul.f32 %v1237_v17, %v3086_v63  ;;  %v1262_v26 = vmul.f32 %v1261_v24, %v3086_v63  ;;  %s3181_s21 = sld [smem:[#allocation2 + $0x183]] }
 0x147   : > { %v1183_v61 = vstv %s3117_s30  ;;  %v764_v17 = vmul.f32 %v763_v60, %v3068_v28  ;;  %s3203_s30 = sld [smem:[#allocation6 + $0x10a]] }
 0x148   : > { %1216 = vrot.lane.b32.xlu1 %v1214_v1, %s2794_s26  ;;  %1192 = vrot.lane.b32.xlu0 %v1190_v2, %s2794_s26  ;;  %v1231_v2 = vstv %s3122_s10  ;;  %s3208_s10 = sld [smem:[#allocation6 + $0x8a]] }
 0x149   : > { %846 = vrot.lane.b32.xlu2 %v844_v3, %s2794_s26  ;;  %v1104_v6 = vpop.f32.mrf.mxu0  ;;  %v1156_v11 = vpop.f32.mrf.mxu2 }
 0x14a   : > { %v1105_v14 = vadd.f32 %v1104_v6, %v1079_v4  ;;  %v1344_v16 = vpop.f32.mrf.mxu1  ;;  %v1649_v4 = vstv %s3142_s19  ;;  %v807_v6 = vstv %s3106_s22  ;;  %s3186_s22 = sld [smem:[#allocation4]] }
 0x14b   : > { %v1179_v13 = vpop.f32.mrf.mxu3  ;;  %s2602_s19 = sld [smem:[#allocation6 + $0xb]] }
 0x14c   : > { %v1130_v15 = vadd.f32 %v1129_v59, %v1105_v14  ;;  %v1207_v59 = vstv %s3114_s25  ;;  %s3201_s25 = sld [smem:[#allocation4 + $0x3]] }
 0x14d   : > { %v1208_v14 = vmul.f32 %v1207_v59, %v3086_v63 }
 0x14e   : > { %v1157_v5 = vadd.f32 %v1156_v11, %v1130_v15  ;;  %v786_v15 = vmul.f32 %v785_v58, %v3068_v28 }
 0x150   : > { %v3095_v8 = vadd.f32 %v1179_v13, %v1157_v5  ;;  %v1255_v13 = vstv %s3124_s11  ;;  %v1184_v5 = vmul.f32 %v1183_v61, %v3086_v63  ;;  %s2608_s11 = sld [smem:[#allocation6 + $0x109]] }
 0x151   : > { %1240 = vrot.lane.b32.xlu2 %v1238_v9, %s2794_s26  ;;  %v1313_v19 = vpop.f32.mrf.mxu0  ;;  %v1370_v20 = vpop.f32.mrf.mxu2  ;;  %v1232_v9 = vmul.f32 %v1231_v2, %v3086_v63  ;;  %v2069_v2 = vstv %s3208_s10  ;;  %s2591_s10 = sld [smem:[#allocation6 + $0x106]] }
 0x152   : > { %v1345_v7 = vadd.f32 %v1344_v16, %v1313_v19  ;;  %v1222_v21 = vmul.f32 %v1221_v18, %v3095_v8  ;;  %v1198_v22 = vmul.f32 %v1197_v12, %v3095_v8  ;;  %v1445_v25 = vpop.f32.mrf.mxu1  ;;  %v1270_v33 = vmul.f32 %v1269_v27, %v3095_v8 }
 0x153   : > { %v1395_v10 = vpop.f32.mrf.mxu3  ;;  %v1246_v40 = vmul.f32 %v1245_v37, %v3095_v8  ;;  %v829_v16 = vstv %s3111_s24  ;;  %v1635_v12 = vstv %s3134_s16  ;;  %v1611_v19 = vstv %s3137_s12  ;;  %s3195_s24 = sld [smem:[#allocation4 + $0x2]] }
 0x154   : > { %v1371_v23 = vadd.f32 %v1370_v20, %v1345_v7  ;;  %1224 = vrot.lane.b32.xlu1 %v1222_v21, %s2794_s26  ;;  %1200 = vrot.lane.b32.xlu0 %v1198_v22, %s2794_s26  ;;  %v808_v20 = vmul.f32 %v807_v6, %v3068_v28  ;;  %v1673_v21 = vstv %s3147_s23  ;;  %v1659_v22 = vstv %s3140_s17  ;;  %s765_s16 = sld [smem:[#allocation6]] }
 0x155   : > { %v2045_v37 = vstv %s3154_s9  ;;  %v2144_v59 = vstv %s3201_s25  ;;  %s2557_s12 = sld [smem:[#allocation6 + $0x100]] }
 0x156   : > { %v1396_v29 = vadd.f32 %v1395_v10, %v1371_v23  ;;  %v1256_v10 = vmul.f32 %v1255_v13, %v3086_v63  ;;  %v1683_v23 = vstv %s3145_s20  ;;  %s2561_s17 = sld [smem:[#allocation6 + $0x180]] }
 0x157   : > { %s2574_s20 = sld [smem:[#allocation6 + $0x103]] }
 0x158   : > { %s2610_s23 = sld [smem:[#allocation6 + $0x10b]] }
 0x159   : > { %1264 = vrot.lane.b32.xlu2 %v1262_v26, %s2794_s26  ;;  %v1422_v30 = vpop.f32.mrf.mxu0  ;;  %v1475_v31 = vpop.f32.mrf.mxu2  ;;  %v830_v26 = vmul.f32 %v829_v16, %v3068_v28  ;;  %v2141_v58 = vstv %s3195_s24  ;;  %s2553_s9 = sld [smem:[#allocation6 + $0x80]] }
 0x15a   : > { %v1423_v32 = vadd.f32 %v1422_v30, %v1396_v29  ;;  %v1557_v39 = vpop.f32.mrf.mxu1  ;;  %v1204_v30 = vadd.f32 %v1184_v5, %v764_v17  ;;  %s2614_s24 = sld [smem:[#allocation6 + $0x18b]] }
 0x15b   : > { %v1506_v34 = vpop.f32.mrf.mxu3  ;;  %s2583_s25 = sld [smem:[#allocation6 + $0x6]] }
 0x15c   : > { %v3119_v36 = vadd.f32 %v1445_v25, %v1423_v32  ;;  %1272 = vrot.lane.b32.xlu1 %v1270_v33, %s2794_s26  ;;  %v1507_v42 = vadd.f32 %v1506_v34, %v1475_v31  ;;  %v1228_v25 = vadd.f32 %v1208_v14, %v786_v15  ;;  %v1252_v31 = vadd.f32 %v1232_v9, %v808_v20 }
 0x15e   : > { %v1618_v38 = vmul.f32 %v1617_v35, %v3119_v36  ;;  %v1642_v47 = vmul.f32 %v1641_v41, %v3119_v36  ;;  %v1666_v52 = vmul.f32 %v1665_v48, %v3119_v36  ;;  %v1690_v1 = vmul.f32 %v1689_v54, %v3119_v36 }
 0x15f   : > { %v1636_v29 = vmul.f32 %v1635_v12, %v3119_v36  ;;  %v1612_v63 = vmul.f32 %v1611_v19, %v3119_v36  ;;  %v1660_v28 = vmul.f32 %v1659_v22, %v3119_v36  ;;  %v1684_v34 = vmul.f32 %v1683_v23, %v3119_v36 }
 0x160   : > { %1620 = vrot.lane.b32.xlu0 %v1618_v38, %s2794_s26  ;;  %v1697_v38 = vstv %s3150_s0  ;;  %s2624_s0 = sshll.u32 %s3423_s27, 4  ;;  %v766_v12 = vstv %s765_s16  ;;  %s3309_s16 = sld [smem:[#allocation6 + $0x189]] }
 0x161   : > { %1248 = vrot.lane.b32.xlu2 %v1246_v40, %s2794_s26  ;;  %v1532_v43 = vpop.f32.mrf.mxu0  ;;  %v1584_v45 = vpop.f32.mrf.mxu2  ;;  %v1276_v40 = vadd.f32 %v1256_v10, %v830_v26  ;;  %v1632_v48 = vadd.f32 %v1612_v63, %v1204_v30  ;;  %s412_s15 = scalar_lea.vmem %s3406_s6, %s2624_s0  ;;  %v767_v19 = vmul.f32 %v766_v12, %v3077_v44 }
 0x162   : > { %v1533_v46 = vadd.f32 %v1532_v43, %v1507_v42  ;;  %v1772_v56 = vpop.f32.mrf.mxu1  ;;  %v2039_v42 = vstv %s3169_s13  ;;  %v2087_v43 = vstv %s3174_s18  ;;  %s2570_s13 = sld [smem:[#allocation6 + $0x83]] }
 0x163   : > { %v1607_v50 = vpop.f32.mrf.mxu3  ;;  %s2566_s18 = sld [smem:[#allocation6 + $0x3]] }
 0x164   : > { %v1558_v49 = vadd.f32 %v1557_v39, %v1533_v46  ;;  %1644 = vrot.lane.b32.xlu1 %v1642_v47, %s2794_s26  ;;  %v2063_v39 = vstv %s3159_s1  ;;  %v1656_v46 = vadd.f32 %v1636_v29, %v1228_v25  ;;  %v2138_v47 = vstv %s3163_s2  ;;  %s2613_s1 = sld [smem:[#allocation6 + $0x18a]] }
 0x165   : > { %s2604_s2 = sld [smem:[#allocation6 + $0x89]] }
 0x166   : > { %v1585_v51 = vadd.f32 %v1584_v45, %v1558_v49  ;;  %v2111_v45 = vstv %s3181_s21  ;;  %v2135_v49 = vstv %s3186_s22  ;;  %s2606_s21 = sld [smem:[#allocation6 + $0x8b]] }
 0x167   : > { %s2578_s22 = sld [smem:[#allocation6 + $0x183]] }
 0x168   : > { %v3156_v55 = vadd.f32 %v1607_v50, %v1585_v51  ;;  %1668 = vrot.lane.b32.xlu0 %v1666_v52, %s2794_s26  ;;  %v1680_v51 = vadd.f32 %v1660_v28, %v1252_v31  ;;  %v1704_v52 = vadd.f32 %v1684_v34, %v1276_v40 }
 0x169   : > { %v1741_v57 = vpop.f32.mrf.mxu0  ;;  %v1798_v3 = vpop.f32.mrf.mxu2 }
 0x16a   : > { %v1773_v62 = vadd.f32 %v1772_v56, %v1741_v57  ;;  %v1626_v0 = vmul.f32 %v1625_v53, %v3156_v55  ;;  %v1650_v18 = vmul.f32 %v1649_v4, %v3156_v55  ;;  %v1674_v33 = vmul.f32 %v1673_v21, %v3156_v55  ;;  %v1873_v35 = vpop.f32.mrf.mxu1 }
 0x16b   : > { %v1823_v7 = vpop.f32.mrf.mxu3  ;;  %v1698_v36 = vmul.f32 %v1697_v38, %v3156_v55  ;;  %v2117_v9 = vstv %s2613_s1  ;;  %v810_v21 = vstv %s2557_s12  ;;  %s2595_s1 = sld [smem:[#allocation6 + $0x186]] }
 0x16c   : > { %v1799_v11 = vadd.f32 %v1798_v3, %v1773_v62  ;;  %1628 = vrot.lane.b32.xlu2 %v1626_v0, %s2794_s26  ;;  %1692 = vrot.lane.b32.xlu1 %v1690_v1, %s2794_s26  ;;  %v2093_v1 = vstv %s3203_s30  ;;  %v811_v22 = vmul.f32 %v810_v21, %v3077_v44  ;;  %s2587_s30 = sld [smem:[#allocation6 + $0x86]] }
 0x16d   : > { %s2618_s12 = sld [smem:[#allocation7 + $0x1]] }
 0x16e   : > { %v1824_v24 = vadd.f32 %v1823_v7, %v1799_v11 }
 0x170   : > { %1652 = vrot.lane.b32.xlu0 %v1650_v18, %s2794_s26 }
 0x171   : > { %v1850_v27 = vpop.f32.mrf.mxu0  ;;  %v1903_v30 = vpop.f32.mrf.mxu2 }
 0x172   : > { %v1851_v32 = vadd.f32 %v1850_v27, %v1824_v24  ;;  %v832_v27 = vstv %s2561_s17  ;;  %s3318_s17 = sld [smem:[#allocation7 + $0x2]] }
 0x173   : > { %v1934_v29 = vpop.f32.mrf.mxu3  ;;  %v833_v63 = vmul.f32 %v832_v27, %v3077_v44 }
 0x174   : > { %v1874_v41 = vadd.f32 %v1873_v35, %v1851_v32  ;;  %1676 = vrot.lane.b32.xlu1 %v1674_v33, %s2794_s26  ;;  %v1935_v33 = vadd.f32 %v1934_v29, %v1903_v30  ;;  %v2125_v30 = vstv %s2614_s24 }
 0x176   : > { %v2046_v50 = vmul.f32 %v2045_v37, %v1874_v41  ;;  %v2064_v53 = vmul.f32 %v2063_v39, %v1874_v41  ;;  %v2040_v54 = vmul.f32 %v2039_v42, %v1874_v41  ;;  %v2088_v56 = vmul.f32 %v2087_v43, %v1874_v41  ;;  %v1985_v39 = vpop.f32.mrf.mxu1 }
 0x177   : > { %v2112_v57 = vmul.f32 %v2111_v45, %v1874_v41  ;;  %v2094_v13 = vmul.f32 %v2093_v1, %v1874_v41  ;;  %v2070_v15 = vmul.f32 %v2069_v2, %v1874_v41  ;;  %v2118_v18 = vmul.f32 %v2117_v9, %v1874_v41 }
 0x178   : > { %2048 = vrot.lane.b32.xlu2 %v2046_v50, %s2794_s26  ;;  %1700 = vrot.lane.b32.xlu0 %v1698_v36, %s2794_s26  ;;  %v2084_v60 = vadd.f32 %v2064_v53, %v1656_v46  ;;  %v2060_v61 = vadd.f32 %v2040_v54, %v1632_v48  ;;  %v2108_v62 = vadd.f32 %v2088_v56, %v1680_v51  ;;  %v2053_v51 = vstv %s2602_s19  ;;  %s3322_s19 = sld [smem:[#allocation7 + $0x3]] }
 0x179   : > { %v2132_v0 = vadd.f32 %v2112_v57, %v1704_v52  ;;  %v1960_v31 = vpop.f32.mrf.mxu0  ;;  %v2012_v43 = vpop.f32.mrf.mxu2  ;;  %v1234_v53 = vstv %s2574_s20 }
 0x17a   : > { %v2139_v3 = vadd.f32 %v2138_v47, %v2084_v60  ;;  %v3229_v4 = vadd.f32 %v2135_v49, %v2060_v61  ;;  %v3231_v6 = vadd.f32 %v2141_v58, %v2108_v62  ;;  %v1961_v37 = vadd.f32 %v1960_v31, %v1935_v33 }
 0x17b   : > { %v3233_v11 = vadd.f32 %v2144_v59, %v2132_v0  ;;  %v2035_v48 = vpop.f32.mrf.mxu3  ;;  %v1235_v58 = vmul.f32 %v1234_v53, %v3095_v8  ;;  %v2101_v61 = vstv %s2610_s23 }
 0x17c   : > { %v2159_v14 = vpack.c.bf16 %v2139_v3, %v2139_v3  ;;  %v2158_v16 = vpack.c.bf16 %v3229_v4, %v3229_v4  ;;  %v2160_v17 = vpack.c.bf16 %v3231_v6, %v3231_v6  ;;  %v2179_v26 = vsel %vm2175_vm2, %v2139_v3, 0.0 }
 0x17d   : > { %v2161_v5 = vpack.c.bf16 %v3233_v11, %v3233_v11  ;;  %v2208_v35 = vmul.f32 %v3229_v4, %v3229_v4  ;;  %v1986_v41 = vadd.f32 %v1985_v39, %v1961_v37  ;;  %v2209_v45 = vmul.f32 %v2139_v3, %v2139_v3 }
 0x17e   : > { %2164 = vst.msk [vmem:[%s412_s15 + $0x4] sm:$0xf] %vm2162_vm1, %v2159_v14  ;;  %v2176_v36 = vsel %vm2175_vm2, %v3229_v4, 0.0  ;;  %v2182_v59 = vsel %vm2175_vm2, %v3231_v6, 0.0 }
 0x17f   : > { %2163 = vst.msk [vmem:[%s412_s15] sm:$0xf] %vm2162_vm1, %v2158_v16  ;;  %v2212_v40 = vsel %vm2175_vm2, %v2208_v35, 0.0  ;;  %v2013_v46 = vadd.f32 %v2012_v43, %v1986_v41  ;;  %v2215_v49 = vsel %vm2175_vm2, %v2209_v45, 0.0  ;;  %v788_v16 = vstv %s2553_s9  ;;  %s3329_s9 = scalar_lea.vmem %s3407_s7, %s2624_s0  ;;  %s2549_s0 = sshll.u32 %s3423_s27, 2 }
 0x180   : > { %2096 = vrot.lane.b32.xlu2 %v2094_v13, %s2794_s26  ;;  %2072 = vrot.lane.b32.xlu0 %v2070_v15, %s2794_s26  ;;  %2165 = vst.msk [vmem:[%s412_s15 + $0x8] sm:$0xf] %vm2162_vm1, %v2160_v17  ;;  %v1210_v13 = vstv %s2570_s13  ;;  %v789_v17 = vmul.f32 %v788_v16, %v3077_v44  ;;  %v2192_v16 = vlaneseq }
 0x181   : > { %2166 = vst.msk [vmem:[%s412_s15 + $0xc] sm:$0xf] %vm2162_vm1, %v2161_v5  ;;  %v3265_v50 = vadd.f32 %v2035_v48, %v2013_v46  ;;  %v1186_v15 = vstv %s2566_s18  ;;  %v1211_v5 = vmul.f32 %v1210_v13, %v3095_v8  ;;  %v1638_v43 = vstv %s2587_s30  ;;  %s2146_s15 = sld [smem:[#allocation7]] }
 0x182   : > { %v1187_v9 = vmul.f32 %v1186_v15, %v3095_v8  ;;  %v1639_v46 = vmul.f32 %v1638_v43, %v3156_v55 }
 0x183   : > { %v2054_v54 = vmul.f32 %v2053_v51, %v3265_v50  ;;  %v2102_v2 = vmul.f32 %v2101_v61, %v3265_v50  ;;  %v1686_v51 = vstv %s2595_s1 }
 0x188   : > { %2120 = vrot.lane.b32.xlu0 %v2118_v18, %s2794_s26  ;;  %v2077_v18 = vstv %s2606_s21  ;;  %s427_s21 = scalar_lea.vmem %s3408_s8, %s2549_s0 }
 0x18b   : > { %v773_v20 = vpop.permute.xlu2 %772 }
 0x18c   : > { %v775_v7 = vadd.f32 %v773_v20, %v767_v19 }
 0x193   : > { %v817_v10 = vpop.permute.xlu2 %816 }
 0x194   : > { %v819_v23 = vadd.f32 %v817_v10, %v811_v22 }
 0x19b   : > { %v781_v24 = vpop.permute.xlu2 %780 }
 0x19c   : > { %v3255_v25 = vadd.f32 %v781_v24, %v775_v7  ;;  %v1258_v24 = vstv %s2578_s22 }
 0x19d   : > { %v1259_v29 = vmul.f32 %v1258_v24, %v3095_v8 }
 0x19e   : > { %2180 = vadd.xlane.f32.xlu1 %v2179_v26 }
 0x1a2   : > { %v839_v32 = vpop.permute.xlu1 %838  ;;  %v795_v47 = vpop.permute.xlu0 %794 }
 0x1a3   : > { %v841_v28 = vadd.f32 %v839_v32, %v833_v63  ;;  %v847_v34 = vpop.permute.xlu2 %846  ;;  %v797_v12 = vadd.f32 %v795_v47, %v789_v17  ;;  %v1614_v32 = vstv %s2583_s25  ;;  %v1662_v47 = vstv %s2591_s10 }
 0x1a4   : > { %v1615_v35 = vmul.f32 %v1614_v32, %v3156_v55  ;;  %v3307_v17 = vand.u32 127, %v2192_v16  ;;  %v2150_v32 = vstv %s2618_s12 }
 0x1a5   : > { %v3261_v38 = vadd.f32 %v847_v34, %v841_v28  ;;  %v2126_v28 = vmul.f32 %v2125_v30, %v3265_v50 }
 0x1a9   : > { %2213 = vadd.xlane.f32.xlu2 %v2212_v40 }
 0x1ab   : > { %v1241_v42 = vpop.permute.xlu2 %1240 }
 0x1ac   : > { %v1243_v60 = vadd.f32 %v1241_v42, %v1235_v58 }
 0x1ae   : > { %v803_v56 = vpop.permute.xlu1 %802  ;;  %v825_v57 = vpop.permute.xlu0 %824 }
 0x1af   : > { %v827_v0 = vadd.f32 %v825_v57, %v819_v23  ;;  %v805_v21 = vadd.f32 %v803_v56, %v797_v12  ;;  %v2078_v23 = vmul.f32 %v2077_v18, %v3265_v50  ;;  %v1687_v57 = vmul.f32 %v1686_v51, %v3156_v55 }
 0x1b0   : > { %v2066_v12 = vstv %s2604_s2  ;;  %v2156_v51 = vstv %s3322_s19 }
 0x1b1   : > { %2216 = vadd.xlane.f32.xlu2 %v2215_v49  ;;  %v1663_v49 = vmul.f32 %v1662_v47, %v3156_v55 }
 0x1b2   : > { %2177 = vadd.xlane.f32.xlu0 %v2176_v36 }
 0x1b3   : > { %v1265_v52 = vpop.permute.xlu2 %1264 }
 0x1b4   : > { %v1267_v63 = vadd.f32 %v1265_v52, %v1259_v29  ;;  %v2210_v52 = vmul.f32 %v3231_v6, %v3231_v6  ;;  %v2185_v6 = vsel %vm2175_vm2, %v3233_v11, 0.0 }
 0x1b7   : > { %2056 = vrot.lane.b32.xlu1 %v2054_v54, %s2794_s26 }
 0x1ba   : > { %2183 = vadd.xlane.f32.xlu0 %v2182_v59  ;;  %v1217_v4 = vpop.permute.xlu1 %1216  ;;  %v1193_v14 = vpop.permute.xlu0 %1192  ;;  %v2218_v59 = vsel %vm2175_vm2, %v2210_v52, 0.0 }
 0x1bb   : > { %v1249_v62 = vpop.permute.xlu2 %1248  ;;  %v1219_v19 = vadd.f32 %v1217_v4, %v1211_v5  ;;  %v1195_v20 = vadd.f32 %v1193_v14, %v1187_v9 }
 0x1bc   : > { %v1251_v1 = vadd.f32 %v1249_v62, %v1243_v60 }
 0x1be   : > { %v3275_v3 = vadd.f32 %v1251_v1, %v827_v0 }
 0x1bf   : > { %2104 = vrot.lane.b32.xlu1 %v2102_v2, %s2794_s26  ;;  %v2211_v2 = vmul.f32 %v3233_v11, %v3233_v11 }
 0x1c1   : > { %v2221_v55 = vsel %vm2175_vm2, %v2211_v2, 0.0 }
 0x1c6   : > { %v1225_v7 = vpop.permute.xlu1 %1224  ;;  %v1201_v10 = vpop.permute.xlu0 %1200 }
 0x1c7   : > { %v1227_v22 = vadd.f32 %v1225_v7, %v1219_v19  ;;  %v1203_v26 = vadd.f32 %v1201_v10, %v1195_v20  ;;  %v1629_v40 = vpop.permute.xlu2 %1628 }
 0x1c9   : > { %v1229_v27 = vadd.f32 %v1227_v22, %v805_v21  ;;  %2080 = vrot.lane.b32.xlu2 %v2078_v23, %s2794_s26  ;;  %v1205_v44 = vadd.f32 %v1203_v26, %v3255_v25  ;;  %v2067_v21 = vmul.f32 %v2066_v12, %v3265_v50  ;;  %v2090_v23 = vstv %s2608_s11 }
 0x1ca   : > { %v2147_v26 = vstv %s2146_s15  ;;  %v2091_v30 = vmul.f32 %v2090_v23, %v3265_v50 }
 0x1ce   : > { %v1273_v31 = vpop.permute.xlu1 %1272 }
 0x1cf   : > { %v1275_v33 = vadd.f32 %v1273_v31, %v1267_v63  ;;  %v2114_v63 = vstv %s3309_s16 }
 0x1d1   : > { %v1277_v34 = vadd.f32 %v1275_v33, %v3261_v38  ;;  %2128 = vrot.lane.b32.xlu2 %v2126_v28, %s2794_s26  ;;  %s2600_s26 = sld [smem:[#allocation6 + $0x9]] }
 0x1d2   : > { %v1621_v37 = vpop.permute.xlu0 %1620  ;;  %v2049_v4 = vpop.permute.xlu2 %2048 }
 0x1d3   : > { %v1623_v39 = vadd.f32 %v1621_v37, %v1615_v35 }
 0x1d5   : > { %v1631_v25 = vadd.f32 %v1629_v40, %v1623_v39  ;;  %v2115_v40 = vmul.f32 %v2114_v63, %v3265_v50 }
 0x1d6   : > { %v1645_v41 = vpop.permute.xlu1 %1644 }
 0x1d7   : > { %v1633_v8 = vadd.f32 %v1631_v25, %v1205_v44  ;;  %v1647_v38 = vadd.f32 %v1645_v41, %v1639_v46  ;;  %v2042_v15 = vstv %s2600_s26  ;;  %v2153_v46 = vstv %s3318_s17 }
 0x1d8   : > { %v2043_v18 = vmul.f32 %v2042_v15, %v3265_v50 }
 0x1da   : > { %v1669_v42 = vpop.permute.xlu0 %1668  ;;  %v2097_v14 = vpop.permute.xlu2 %2096  ;;  %v2051_v7 = vadd.f32 %v2049_v4, %v2043_v18 }
 0x1db   : > { %v1671_v53 = vadd.f32 %v1669_v42, %v1663_v49  ;;  %v2099_v28 = vadd.f32 %v2097_v14, %v2091_v30 }
 0x1de   : > { %v1693_v45 = vpop.permute.xlu1 %1692 }
 0x1df   : > { %v1695_v60 = vadd.f32 %v1693_v45, %v1687_v57 }
 0x1e2   : > { %v1653_v48 = vpop.permute.xlu0 %1652 }
 0x1e3   : > { %v1655_v36 = vadd.f32 %v1653_v48, %v1647_v38 }
 0x1e5   : > { %v1657_v54 = vadd.f32 %v1655_v36, %v1229_v27 }
 0x1e6   : > { %v1677_v56 = vpop.permute.xlu1 %1676 }
 0x1e7   : > { %v1679_v58 = vadd.f32 %v1677_v56, %v1671_v53 }
 0x1e9   : > { %v3296_v61 = vadd.f32 %v1679_v58, %v3275_v3  ;;  %2219 = vadd.xlane.f32.xlu1 %v2218_v59 }
 0x1ea   : > { %v1701_v62 = vpop.permute.xlu0 %1700 }
 0x1eb   : > { %v1703_v0 = vadd.f32 %v1701_v62, %v1695_v60 }
 0x1ed   : > { %v3298_v1 = vadd.f32 %v1703_v0, %v1277_v34 }
 0x1f1   : > { %2186 = vadd.xlane.f32.xlu1 %v2185_v6 }
 0x1f2   : > { %v2073_v19 = vpop.permute.xlu0 %2072 }
 0x1f3   : > { %v2075_v24 = vadd.f32 %v2073_v19, %v2067_v21 }
 0x1fa   : > { %2222 = vadd.xlane.f32.xlu2 %v2221_v55  ;;  %v2121_v34 = vpop.permute.xlu0 %2120 }
 0x1fb   : > { %v2123_v43 = vadd.f32 %v2121_v34, %v2115_v40 }
 0x211   : > { %v3305_v13 = vpop.xlane.xlu1 %2180 }
 0x212   : > { %v2195_v14 = vperm.slane %v3305_v13, %v3307_v17 }
 0x21c   : > { %v2214_v3 = vpop.xlane.xlu2 %2213 }
 0x21d   : > { %v2228_v11 = vperm.slane %v2214_v3, %v3307_v17 }
 0x224   : > { %v2217_v5 = vpop.xlane.xlu2 %2216 }
 0x225   : > { %v2229_v9 = vperm.slane %v2217_v5, %v3307_v17 }
 0x227   : > { %v3315_v20 = vsel %vm2198_vm3, %v2229_v9, %v2228_v11 }
 0x229   : > { %v2057_v22 = vpop.permute.xlu1 %2056 }
 0x22a   : > { %v2059_v10 = vadd.f32 %v2057_v22, %v2051_v7 }
 0x22c   : > { %v2061_v27 = vadd.f32 %v2059_v10, %v1633_v8  ;;  %v2081_v44 = vpop.permute.xlu2 %2080 }
 0x22d   : > { %v2083_v29 = vadd.f32 %v2081_v44, %v2075_v24 }
 0x22e   : > { %v2148_v31 = vadd.f32 %v2147_v26, %v2061_v27 }
 0x22f   : > { %v2085_v33 = vadd.f32 %v2083_v29, %v1657_v54 }
 0x230   : > { %v2167_v35 = vpack.c.bf16 %v2148_v31, %v2148_v31  ;;  %v2239_v37 = vsel %vm2175_vm2, %v2148_v31, 0.0  ;;  %v2266_v39 = vmul.f32 %v2148_v31, %v2148_v31 }
 0x231   : > { %v2151_v25 = vadd.f32 %v2150_v32, %v2085_v33  ;;  %v2105_v41 = vpop.permute.xlu1 %2104  ;;  %2240 = vadd.xlane.f32.xlu2 %v2239_v37 }
 0x232   : > { %2171 = vst.msk [vmem:[%s3329_s9] sm:$0xf] %vm2162_vm1, %v2167_v35  ;;  %v2107_v8 = vadd.f32 %v2105_v41, %v2099_v28  ;;  %v2270_v42 = vsel %vm2175_vm2, %v2266_v39, 0.0 }
 0x233   : > { %v2168_v45 = vpack.c.bf16 %v2151_v25, %v2151_v25  ;;  %2271 = vadd.xlane.f32.xlu1 %v2270_v42  ;;  %v2242_v47 = vsel %vm2175_vm2, %v2151_v25, 0.0  ;;  %v2267_v48 = vmul.f32 %v2151_v25, %v2151_v25 }
 0x234   : > { %v2109_v38 = vadd.f32 %v2107_v8, %v3296_v61  ;;  %v2129_v50 = vpop.permute.xlu2 %2128  ;;  %2243 = vadd.xlane.f32.xlu0 %v2242_v47 }
 0x235   : > { %2172 = vst.msk [vmem:[%s3329_s9 + $0x4] sm:$0xf] %vm2162_vm1, %v2168_v45  ;;  %v2131_v49 = vadd.f32 %v2129_v50, %v2123_v43  ;;  %v2273_v54 = vsel %vm2175_vm2, %v2267_v48, 0.0 }
 0x236   : > { %v2154_v36 = vadd.f32 %v2153_v46, %v2109_v38 }
 0x237   : > { %v2133_v52 = vadd.f32 %v2131_v49, %v3298_v1  ;;  %v2178_v1 = vpop.xlane.xlu0 %2177 }
 0x238   : > { %v2169_v53 = vpack.c.bf16 %v2154_v36, %v2154_v36  ;;  %v2268_v56 = vmul.f32 %v2154_v36, %v2154_v36  ;;  %v2245_v60 = vsel %vm2175_vm2, %v2154_v36, 0.0  ;;  %v2194_v55 = vperm.slane %v2178_v1, %v3307_v17 }
 0x239   : > { %v2157_v57 = vadd.f32 %v2156_v51, %v2133_v52  ;;  %2274 = vadd.xlane.f32.xlu2 %v2273_v54 }
 0x23a   : > { %2173 = vst.msk [vmem:[%s3329_s9 + $0x8] sm:$0xf] %vm2162_vm1, %v2169_v53  ;;  %v2276_v58 = vsel %vm2175_vm2, %v2268_v56, 0.0  ;;  %v2199_v16 = vsel %vm2198_vm3, %v2195_v14, %v2194_v55 }
 0x23b   : > { %v2170_v59 = vpack.c.bf16 %v2157_v57, %v2157_v57  ;;  %2277 = vadd.xlane.f32.xlu1 %v2276_v58  ;;  %v2269_v61 = vmul.f32 %v2157_v57, %v2157_v57  ;;  %v2248_v0 = vsel %vm2175_vm2, %v2157_v57, 0.0 }
 0x23c   : > { %2246 = vadd.xlane.f32.xlu0 %v2245_v60 }
 0x23d   : > { %2174 = vst.msk [vmem:[%s3329_s9 + $0xc] sm:$0xf] %vm2162_vm1, %v2170_v59  ;;  %v2279_v62 = vsel %vm2175_vm2, %v2269_v61, 0.0 }
 0x23f   : > { %v2184_v2 = vpop.xlane.xlu0 %2183 }
 0x240   : > { %v2196_v4 = vperm.slane %v2184_v2, %v3307_v17 }
 0x241   : > { %2280 = vadd.xlane.f32.xlu2 %v2279_v62 }
 0x242   : > { %v2201_v5 = vsel %vm2200_vm4, %v2196_v4, %v2199_v16 }
 0x244   : > { %2249 = vadd.xlane.f32.xlu0 %v2248_v0 }
 0x25c   : > { %v2220_v6 = vpop.xlane.xlu1 %2219 }
 0x25d   : > { %v2230_v18 = vperm.slane %v2220_v6, %v3307_v17 }
 0x25f   : > { %v2233_v13 = vsel %vm2200_vm4, %v2230_v18, %v3315_v20 }
 0x264   : > { %v2187_v3 = vpop.xlane.xlu1 %2186 }
 0x265   : > { %v2197_v15 = vperm.slane %v2187_v3, %v3307_v17 }
 0x267   : > { %v2203_v11 = vsel %vm2202_vm5, %v2197_v15, %v2201_v5 }
 0x268   : > { %v2205_v9 = vsel %vm2162_vm1, %v2203_v11, 0.0 }
 0x269   : > { %2206 = vadd.xlane.f32.xlu0 %v2205_v9 }
 0x26d   : > { %v2223_v12 = vpop.xlane.xlu2 %2222 }
 0x26e   : > { %v2231_v19 = vperm.slane %v2223_v12, %v3307_v17 }
 0x270   : > { %v2234_v7 = vsel %vm2202_vm5, %v2231_v19, %v2233_v13 }
 0x271   : > { %v2236_v21 = vsel %vm2162_vm1, %v2234_v7, 0.0 }
 0x272   : > { %2237 = vadd.xlane.f32.xlu1 %v2236_v21 }
 0x2a4   : > { %v2241_v22 = vpop.xlane.xlu2 %2240 }
 0x2a5   : > { %v2255_v28 = vperm.slane %v2241_v22, %v3307_v17 }
 0x2a6   : > { %v2272_v10 = vpop.xlane.xlu1 %2271 }
 0x2a7   : > { %v2244_v23 = vpop.xlane.xlu0 %2243  ;;  %v2286_v29 = vperm.slane %v2272_v10, %v3307_v17 }
 0x2a8   : > { %v2256_v20 = vperm.slane %v2244_v23, %v3307_v17 }
 0x2aa   : > { %v2259_v39 = vsel %vm2198_vm3, %v2256_v20, %v2255_v28 }
 0x2ac   : > { %v2275_v24 = vpop.xlane.xlu2 %2274 }
 0x2ad   : > { %v2287_v26 = vperm.slane %v2275_v24, %v3307_v17 }
 0x2ae   : > { %v2278_v27 = vpop.xlane.xlu1 %2277 }
 0x2af   : > { %v2247_v44 = vpop.xlane.xlu0 %2246  ;;  %v2288_v30 = vperm.slane %v2278_v27, %v3307_v17  ;;  %v2290_v63 = vsel %vm2198_vm3, %v2287_v26, %v2286_v29 }
 0x2b0   : > { %v2257_v32 = vperm.slane %v2247_v44, %v3307_v17 }
 0x2b1   : > { %v2291_v34 = vsel %vm2200_vm4, %v2288_v30, %v2290_v63 }
 0x2b2   : > { %v2260_v41 = vsel %vm2200_vm4, %v2257_v32, %v2259_v39 }
 0x2b4   : > { %v2281_v31 = vpop.xlane.xlu2 %2280 }
 0x2b5   : > { %v2289_v33 = vperm.slane %v2281_v31, %v3307_v17 }
 0x2b7   : > { %v2250_v35 = vpop.xlane.xlu0 %2249  ;;  %v2292_v37 = vsel %vm2202_vm5, %v2289_v33, %v2291_v34 }
 0x2b8   : > { %v2258_v40 = vperm.slane %v2250_v35, %v3307_v17  ;;  %v2294_v25 = vsel %vm2162_vm1, %v2292_v37, 0.0 }
 0x2b9   : > { %2295 = vadd.xlane.f32.xlu0 %v2294_v25 }
 0x2ba   : > { %v2261_v8 = vsel %vm2202_vm5, %v2258_v40, %v2260_v41 }
 0x2bb   : > { %v2263_v42 = vsel %vm2162_vm1, %v2261_v8, 0.0 }
 0x2bc   : > { %2264 = vadd.xlane.f32.xlu2 %v2263_v42 }
 0x2dc   : > { %v2207_v43 = vpop.xlane.xlu0 %2206 }
 0x2dd   : > { %v2298_v38 = vperm.slane %v2207_v43, %v3307_v17 }
 0x2e5   : > { %v2238_v45 = vpop.xlane.xlu1 %2237 }
 0x2e6   : > { %v2301_v46 = vperm.slane %v2238_v45, %v3307_v17 }
 0x2e8   : > { %v2310_v49 = vsel %vm2309_vm6, %v2298_v38, %v2301_v46 }
 0x32c   : > { %v2296_v47 = vpop.xlane.xlu0 %2295 }
 0x32d   : > { %v2307_v36 = vperm.slane %v2296_v47, %v3307_v17 }
 0x32f   : > { %v2265_v50 = vpop.xlane.xlu2 %2264 }
 0x330   : > { %v2304_v48 = vperm.slane %v2265_v50, %v3307_v17 }
 0x332   : > { %v2312_v51 = vsel %vm2311_vm7, %v2310_v49, %v2304_v48 }
 0x333   : > { %v2314_v52 = vsel %vm2313_vm8, %v2312_v51, %v2307_v36 }
 0x334   : > { %2316 = vst.msk [vmem:[%s427_s21] sm:$0xf] %vm2315_vm9, %v2314_v52 }
 0x335 PF: > { %s22_s29 = sadd.s32 1, %s2787_s29   ;;  %s3418_s27 = smov %s2783_s28 }
 0x336   : > { %p19_p8 = scmp.ge.s32.totalorder %s22_s29, 4   ;;  %s3419_s28 = smov %s3421_s14 }
 0x338   :  { %21 = sbr.rel (!%p19_p8) target bundleno = 8 (0x8), region = 118 }
 0x33d   :  { %2386 = vsyncpa [#allocation3], 1 }
 0x33e   :  { %2388 = vsyncpa [#allocation3 + $0x1], 1 }
 0x33f   :  { %2389 = vsyncpa [#allocation5], 1 }
 0x340   :  { %2390 = vsyncpa [#allocation8], 1 }

</bundles_post_ra>
